<compile_context>
chip_gen: v7x
topology: tpu7x:2x2x1
jax: 0.10.0
libtpu: 0.0.40
codegen_flags: <defaults>
</compile_context>

<pallas_src>
import jax
import jax.numpy as jnp
import numpy as np
from jax import lax
from jax.experimental import pallas as pl
from jax.experimental.pallas import tpu as pltpu


def lstm_net_kernel(x_ref, wih_ref, whh_ref, b_ref, wout_ref, bout_ref,
                    out_ref, gxi_sc, gxf_sc, gxg_sc, gxo_sc, hh_sc):
    """Whole sequence resident in VMEM.

    x_ref    : (seq, A)      f32
    wih_ref  : (4, A, H)     per-gate W_ih^T blocks      (mxu dtype)
    whh_ref  : (4, H, H)     per-gate W_hh^T blocks      (mxu dtype)
    b_ref    : (4, 1, H)     per-gate (b_ih + b_hh)      f32
    wout_ref : (H, T)        W_out^T                     (mxu dtype)
    bout_ref : (1, T)        b_out                       f32
    out_ref  : (seq, T)      f32
    gx*_sc   : (seq, H) x 4  hoisted per-gate input projection (scratch, f32)
    hh_sc    : (seq, H)      hidden-state history (scratch, f32)
    """
    h_dim = whh_ref.shape[-1]
    seq = x_ref.shape[0]
    mxu_dtype = whh_ref.dtype

    # --- hoisted input projection: off the serial recurrence chain ---------
    # Four (seq, A) @ (A, H) matmuls so every per-gate value already lives in
    # lanes 0..H-1 (no per-step lane slicing later).
    xm = x_ref[...].astype(mxu_dtype)                                # (seq, A)
    gx_scs = (gxi_sc, gxf_sc, gxg_sc, gxo_sc)
    for g in range(4):
        gx_scs[g][...] = (jnp.dot(xm, wih_ref[g],
                                  preferred_element_type=jnp.float32)
                          + b_ref[g])                                # (seq, H)

    # --- hoist the recurrent weights: loaded from VMEM once ----------------
    w_rec = tuple(whh_ref[g] for g in range(4))                      # 4x (H, H)

    # --- time recurrence: h/c live in vregs (fori_loop carry) --------------
    def step(t, carry):
        h, c = carry                                                 # (1, H) f32
        hm = h.astype(mxu_dtype)                                     # MXU operand

        pre_i = gxi_sc[pl.ds(t, 1), :] + jnp.dot(
            hm, w_rec[0], preferred_element_type=jnp.float32)
        pre_f = gxf_sc[pl.ds(t, 1), :] + jnp.dot(
            hm, w_rec[1], preferred_element_type=jnp.float32)
        pre_g = gxg_sc[pl.ds(t, 1), :] + jnp.dot(
            hm, w_rec[2], preferred_element_type=jnp.float32)
        pre_o = gxo_sc[pl.ds(t, 1), :] + jnp.dot(
            hm, w_rec[3], preferred_element_type=jnp.float32)

        # Elementwise gate math stays in f32 (v5e has no bf16 VPU/EUP).
        i_g = jax.nn.sigmoid(pre_i)
        f_g = jax.nn.sigmoid(pre_f)
        g_g = jnp.tanh(pre_g)
        o_g = jax.nn.sigmoid(pre_o)

        c_new = f_g * c + i_g * g_g
        h_new = o_g * jnp.tanh(c_new)

        hh_sc[pl.ds(t, 1), :] = h_new        # history for the batched head
        return (h_new, c_new)

    h0 = jnp.zeros((1, h_dim), jnp.float32)
    c0 = jnp.zeros((1, h_dim), jnp.float32)
    # seq is tiny and static -> full unroll (use a fixed small unroll factor
    # once seq is large).
    lax.fori_loop(0, seq, step, (h0, c0), unroll=True)

    # --- hoisted output head: one batched matmul + one store ---------------
    out_ref[...] = (jnp.dot(hh_sc[...].astype(mxu_dtype), wout_ref[...],
                            preferred_element_type=jnp.float32)
                    + bout_ref[...])                                 # (seq, T)


def prepare_params(w_ih, w_hh, b_ih, b_hh, w_out, b_out,
                   mxu_dtype=jnp.bfloat16):
    """One-time (parameter-load time) weight prep.

    PyTorch layout in: w_ih (4H, A), w_hh (4H, H), b_ih/b_hh (4H,),
                       w_out (T, H), b_out (T,).
    Returns per-gate, pre-transposed arrays; matmul operands cast to
    `mxu_dtype` (bf16 = fast MXU path; float32 = strict-parity path),
    biases kept in f32.
    """
    w_ih = jnp.asarray(w_ih, jnp.float32)
    w_hh = jnp.asarray(w_hh, jnp.float32)
    four_h, a_dim = w_ih.shape
    h_dim = w_hh.shape[1]
    assert four_h == 4 * h_dim

    # (4H, A) -> (4, H, A) -> (4, A, H): wih_g[g, k, j] = w_ih[g*H + j, k]
    wih_g = jnp.transpose(w_ih.reshape(4, h_dim, a_dim), (0, 2, 1)).astype(mxu_dtype)
    whh_g = jnp.transpose(w_hh.reshape(4, h_dim, h_dim), (0, 2, 1)).astype(mxu_dtype)
    b = (jnp.asarray(b_ih, jnp.float32)
         + jnp.asarray(b_hh, jnp.float32)).reshape(4, 1, h_dim)      # f32
    wout_t = jnp.asarray(w_out, jnp.float32).T.astype(mxu_dtype)     # (H, T)
    bout = jnp.asarray(b_out, jnp.float32).reshape(1, -1)            # (1, T) f32
    return wih_g, whh_g, b, wout_t, bout


def lstm_net_forward_prepared(x, wih_g, whh_g, b, wout_t, bout):
    """x: (seq, a_dim) float32; weights already prepared by prepare_params."""
    x = jnp.asarray(x, jnp.float32)
    seq = x.shape[0]
    h_dim = whh_g.shape[-1]
    t_dim = wout_t.shape[1]

    vmem_spec = pl.BlockSpec(memory_space=pltpu.MemorySpace.VMEM)

    return pl.pallas_call(
        lstm_net_kernel,
        out_shape=jax.ShapeDtypeStruct((seq, t_dim), jnp.float32),
        in_specs=[vmem_spec] * 6,
        out_specs=vmem_spec,
        scratch_shapes=[pltpu.VMEM((seq, h_dim), jnp.float32),   # gx_i
                        pltpu.VMEM((seq, h_dim), jnp.float32),   # gx_f
                        pltpu.VMEM((seq, h_dim), jnp.float32),   # gx_g
                        pltpu.VMEM((seq, h_dim), jnp.float32),   # gx_o
                        pltpu.VMEM((seq, h_dim), jnp.float32)],  # h history
    )(x, wih_g, whh_g, b, wout_t, bout)


def lstm_net_forward(x, w_ih, w_hh, b_ih, b_hh, w_out, b_out,
                     mxu_dtype=jnp.bfloat16):
    """Convenience wrapper matching the raw PyTorch parameter layout."""
    params = prepare_params(w_ih, w_hh, b_ih, b_hh, w_out, b_out, mxu_dtype)
    return lstm_net_forward_prepared(x, *params)


def _reference_forward_np(x, w_ih, w_hh, b_ih, b_hh, w_out, b_out):
    """Float64 numpy reference reproducing torch.nn.LSTM + Linear (batch=1)."""
    x = np.asarray(x, np.float64)
    w_ih = np.asarray(w_ih, np.float64)
    w_hh = np.asarray(w_hh, np.float64)
    b_ih = np.asarray(b_ih, np.float64)
    b_hh = np.asarray(b_hh, np.float64)
    w_out = np.asarray(w_out, np.float64)
    b_out = np.asarray(b_out, np.float64)
    h_dim = w_hh.shape[1]

    def sig(z):
        return 1.0 / (1.0 + np.exp(-z))

    h = np.zeros(h_dim, np.float64)
    c = np.zeros(h_dim, np.float64)
    outs = []
    for t in range(x.shape[0]):
        gates = w_ih @ x[t] + b_ih + w_hh @ h + b_hh
        i = sig(gates[0 * h_dim:1 * h_dim])
        f = sig(gates[1 * h_dim:2 * h_dim])
        g = np.tanh(gates[2 * h_dim:3 * h_dim])
        o = sig(gates[3 * h_dim:4 * h_dim])
        c = f * c + i * g
        h = o * np.tanh(c)
        outs.append(w_out @ h + b_out)
    return np.stack(outs, axis=0)


if __name__ == "__main__":
    # Small, deterministic setup consistent with LSTM_NET(a_dim, h_dim, t_dim).
    seq, a_dim, h_dim, t_dim = 8, 16, 32, 4

    key = jax.random.PRNGKey(0)
    ks = jax.random.split(key, 7)
    bound = 1.0 / float(np.sqrt(h_dim))   # PyTorch default init scale

    x     = jax.random.normal(ks[0], (seq, a_dim), jnp.float32)
    w_ih  = jax.random.uniform(ks[1], (4 * h_dim, a_dim), jnp.float32, -bound, bound)
    w_hh  = jax.random.uniform(ks[2], (4 * h_dim, h_dim), jnp.float32, -bound, bound)
    b_ih  = jax.random.uniform(ks[3], (4 * h_dim,), jnp.float32, -bound, bound)
    b_hh  = jax.random.uniform(ks[4], (4 * h_dim,), jnp.float32, -bound, bound)
    w_out = jax.random.uniform(ks[5], (t_dim, h_dim), jnp.float32, -bound, bound)
    b_out = jax.random.uniform(ks[6], (t_dim,), jnp.float32, -bound, bound)

    ref = _reference_forward_np(x, w_ih, w_hh, b_ih, b_hh, w_out, b_out)

    # Fast path: bf16 MXU operands, f32 accumulation, f32 elementwise math.
    params_fast = prepare_params(w_ih, w_hh, b_ih, b_hh, w_out, b_out,
                                 mxu_dtype=jnp.bfloat16)
    tags_fast = jax.block_until_ready(lstm_net_forward_prepared(x, *params_fast))

    # f32-operand path (for stricter parity with an fp32 reference).
    params_f32 = prepare_params(w_ih, w_hh, b_ih, b_hh, w_out, b_out,
                                mxu_dtype=jnp.float32)
    tags_f32 = jax.block_until_ready(lstm_net_forward_prepared(x, *params_f32))

    assert tags_fast.shape == (seq, t_dim)
    assert tags_f32.shape == (seq, t_dim)
    # Tolerances sized for bf16-level MXU error at these shapes (typical
    # deviation is ~1e-3; anything structural would be O(0.1+)).
    assert np.allclose(np.asarray(tags_f32, np.float64), ref, atol=5e-2, rtol=5e-2)
    assert np.allclose(np.asarray(tags_fast, np.float64), ref, atol=5e-2, rtol=5e-2)

    print("KERNEL_OK")
</pallas_src>

<mosaic_0001>
module attributes {stable_mosaic.version = 11 : i64} {
  func.func @lstm_net_kernel(%arg0: memref<8x16xf32, #tpu.memory_space<vmem>>, %arg1: memref<4x16x32xbf16, #tpu.memory_space<vmem>>, %arg2: memref<4x32x32xbf16, #tpu.memory_space<vmem>>, %arg3: memref<4x1x32xf32, #tpu.memory_space<vmem>>, %arg4: memref<32x4xbf16, #tpu.memory_space<vmem>>, %arg5: memref<1x4xf32, #tpu.memory_space<vmem>>, %arg6: memref<8x4xf32, #tpu.memory_space<vmem>>, %arg7: memref<8x32xf32, #tpu.memory_space<vmem>>, %arg8: memref<8x32xf32, #tpu.memory_space<vmem>>, %arg9: memref<8x32xf32, #tpu.memory_space<vmem>>, %arg10: memref<8x32xf32, #tpu.memory_space<vmem>>, %arg11: memref<8x32xf32, #tpu.memory_space<vmem>>) attributes {dimension_semantics = [], scalar_prefetch = 0 : i64, scratch_operands = 5 : i64, tpu.core_type = #tpu.core_type<tc>} {
    %c0 = arith.constant 0 : index
    %c0_0 = arith.constant 0 : index
    %0 = vector.load %arg0[%c0, %c0_0] : memref<8x16xf32, #tpu.memory_space<vmem>>, vector<8x16xf32>
    %1 = arith.truncf %0 : vector<8x16xf32> to vector<8x16xbf16>
    %c0_1 = arith.constant 0 : index
    %c0_2 = arith.constant 0 : index
    %c0_3 = arith.constant 0 : index
    %2 = vector.load %arg1[%c0_1, %c0_2, %c0_3] : memref<4x16x32xbf16, #tpu.memory_space<vmem>>, vector<1x16x32xbf16>
    %3 = vector.shape_cast %2 : vector<1x16x32xbf16> to vector<16x32xbf16>
    %cst = arith.constant dense<0.000000e+00> : vector<8x32xf32>
    %4 = tpu.matmul %1, %3, %cst {dimension_numbers = #tpu.dot_dimension_numbers<[1], [0], [0], [1], [0, 0, 1, 1], [], []>} : vector<8x16xbf16>, vector<16x32xbf16>, vector<8x32xf32> -> vector<8x32xf32>
    %c0_4 = arith.constant 0 : index
    %c0_5 = arith.constant 0 : index
    %c0_6 = arith.constant 0 : index
    %5 = vector.load %arg3[%c0_4, %c0_5, %c0_6] : memref<4x1x32xf32, #tpu.memory_space<vmem>>, vector<1x1x32xf32>
    %6 = vector.shape_cast %5 : vector<1x1x32xf32> to vector<1x32xf32>
    %7 = vector.broadcast %6 : vector<1x32xf32> to vector<8x32xf32>
    %8 = arith.addf %4, %7 : vector<8x32xf32>
    %c0_7 = arith.constant 0 : index
    %c0_8 = arith.constant 0 : index
    %9 = vector.load %arg7[%c0_7, %c0_8] : memref<8x32xf32, #tpu.memory_space<vmem>>, vector<8x32xf32>
    tpu.vector_store %arg7[%c0_7, %c0_8], %8 {strides = array<i32>} : memref<8x32xf32, #tpu.memory_space<vmem>>, vector<8x32xf32>,
    %c1 = arith.constant 1 : index
    %c0_9 = arith.constant 0 : index
    %c0_10 = arith.constant 0 : index
    %10 = vector.load %arg1[%c1, %c0_9, %c0_10] : memref<4x16x32xbf16, #tpu.memory_space<vmem>>, vector<1x16x32xbf16>
    %11 = vector.shape_cast %10 : vector<1x16x32xbf16> to vector<16x32xbf16>
    %cst_11 = arith.constant dense<0.000000e+00> : vector<8x32xf32>
    %12 = tpu.matmul %1, %11, %cst_11 {dimension_numbers = #tpu.dot_dimension_numbers<[1], [0], [0], [1], [0, 0, 1, 1], [], []>} : vector<8x16xbf16>, vector<16x32xbf16>, vector<8x32xf32> -> vector<8x32xf32>
    %c1_12 = arith.constant 1 : index
    %c0_13 = arith.constant 0 : index
    %c0_14 = arith.constant 0 : index
    %13 = vector.load %arg3[%c1_12, %c0_13, %c0_14] : memref<4x1x32xf32, #tpu.memory_space<vmem>>, vector<1x1x32xf32>
    %14 = vector.shape_cast %13 : vector<1x1x32xf32> to vector<1x32xf32>
    %15 = vector.broadcast %14 : vector<1x32xf32> to vector<8x32xf32>
    %16 = arith.addf %12, %15 : vector<8x32xf32>
    %c0_15 = arith.constant 0 : index
    %c0_16 = arith.constant 0 : index
    %17 = vector.load %arg8[%c0_15, %c0_16] : memref<8x32xf32, #tpu.memory_space<vmem>>, vector<8x32xf32>
    tpu.vector_store %arg8[%c0_15, %c0_16], %16 {strides = array<i32>} : memref<8x32xf32, #tpu.memory_space<vmem>>, vector<8x32xf32>,
    %c2 = arith.constant 2 : index
    %c0_17 = arith.constant 0 : index
    %c0_18 = arith.constant 0 : index
    %18 = vector.load %arg1[%c2, %c0_17, %c0_18] : memref<4x16x32xbf16, #tpu.memory_space<vmem>>, vector<1x16x32xbf16>
    %19 = vector.shape_cast %18 : vector<1x16x32xbf16> to vector<16x32xbf16>
    %cst_19 = arith.constant dense<0.000000e+00> : vector<8x32xf32>
    %20 = tpu.matmul %1, %19, %cst_19 {dimension_numbers = #tpu.dot_dimension_numbers<[1], [0], [0], [1], [0, 0, 1, 1], [], []>} : vector<8x16xbf16>, vector<16x32xbf16>, vector<8x32xf32> -> vector<8x32xf32>
    %c2_20 = arith.constant 2 : index
    %c0_21 = arith.constant 0 : index
    %c0_22 = arith.constant 0 : index
    %21 = vector.load %arg3[%c2_20, %c0_21, %c0_22] : memref<4x1x32xf32, #tpu.memory_space<vmem>>, vector<1x1x32xf32>
    %22 = vector.shape_cast %21 : vector<1x1x32xf32> to vector<1x32xf32>
    %23 = vector.broadcast %22 : vector<1x32xf32> to vector<8x32xf32>
    %24 = arith.addf %20, %23 : vector<8x32xf32>
    %c0_23 = arith.constant 0 : index
    %c0_24 = arith.constant 0 : index
    %25 = vector.load %arg9[%c0_23, %c0_24] : memref<8x32xf32, #tpu.memory_space<vmem>>, vector<8x32xf32>
    tpu.vector_store %arg9[%c0_23, %c0_24], %24 {strides = array<i32>} : memref<8x32xf32, #tpu.memory_space<vmem>>, vector<8x32xf32>,
    %c3 = arith.constant 3 : index
    %c0_25 = arith.constant 0 : index
    %c0_26 = arith.constant 0 : index
    %26 = vector.load %arg1[%c3, %c0_25, %c0_26] : memref<4x16x32xbf16, #tpu.memory_space<vmem>>, vector<1x16x32xbf16>
    %27 = vector.shape_cast %26 : vector<1x16x32xbf16> to vector<16x32xbf16>
    %cst_27 = arith.constant dense<0.000000e+00> : vector<8x32xf32>
    %28 = tpu.matmul %1, %27, %cst_27 {dimension_numbers = #tpu.dot_dimension_numbers<[1], [0], [0], [1], [0, 0, 1, 1], [], []>} : vector<8x16xbf16>, vector<16x32xbf16>, vector<8x32xf32> -> vector<8x32xf32>
    %c3_28 = arith.constant 3 : index
    %c0_29 = arith.constant 0 : index
    %c0_30 = arith.constant 0 : index
    %29 = vector.load %arg3[%c3_28, %c0_29, %c0_30] : memref<4x1x32xf32, #tpu.memory_space<vmem>>, vector<1x1x32xf32>
    %30 = vector.shape_cast %29 : vector<1x1x32xf32> to vector<1x32xf32>
    %31 = vector.broadcast %30 : vector<1x32xf32> to vector<8x32xf32>
    %32 = arith.addf %28, %31 : vector<8x32xf32>
    %c0_31 = arith.constant 0 : index
    %c0_32 = arith.constant 0 : index
    %33 = vector.load %arg10[%c0_31, %c0_32] : memref<8x32xf32, #tpu.memory_space<vmem>>, vector<8x32xf32>
    tpu.vector_store %arg10[%c0_31, %c0_32], %32 {strides = array<i32>} : memref<8x32xf32, #tpu.memory_space<vmem>>, vector<8x32xf32>,
    %c0_33 = arith.constant 0 : index
    %c0_34 = arith.constant 0 : index
    %c0_35 = arith.constant 0 : index
    %34 = vector.load %arg2[%c0_33, %c0_34, %c0_35] : memref<4x32x32xbf16, #tpu.memory_space<vmem>>, vector<1x32x32xbf16>
    %35 = vector.shape_cast %34 : vector<1x32x32xbf16> to vector<32x32xbf16>
    %c1_36 = arith.constant 1 : index
    %c0_37 = arith.constant 0 : index
    %c0_38 = arith.constant 0 : index
    %36 = vector.load %arg2[%c1_36, %c0_37, %c0_38] : memref<4x32x32xbf16, #tpu.memory_space<vmem>>, vector<1x32x32xbf16>
    %37 = vector.shape_cast %36 : vector<1x32x32xbf16> to vector<32x32xbf16>
    %c2_39 = arith.constant 2 : index
    %c0_40 = arith.constant 0 : index
    %c0_41 = arith.constant 0 : index
    %38 = vector.load %arg2[%c2_39, %c0_40, %c0_41] : memref<4x32x32xbf16, #tpu.memory_space<vmem>>, vector<1x32x32xbf16>
    %39 = vector.shape_cast %38 : vector<1x32x32xbf16> to vector<32x32xbf16>
    %c3_42 = arith.constant 3 : index
    %c0_43 = arith.constant 0 : index
    %c0_44 = arith.constant 0 : index
    %40 = vector.load %arg2[%c3_42, %c0_43, %c0_44] : memref<4x32x32xbf16, #tpu.memory_space<vmem>>, vector<1x32x32xbf16>
    %41 = vector.shape_cast %40 : vector<1x32x32xbf16> to vector<32x32xbf16>
    %cst_45 = arith.constant 0.000000e+00 : f32
    %42 = vector.broadcast %cst_45 : f32 to vector<1x32xf32>
    %cst_46 = arith.constant 0.000000e+00 : f32
    %43 = vector.broadcast %cst_46 : f32 to vector<1x32xf32>
    %c0_i32 = arith.constant 0 : i32
    %44 = arith.truncf %42 : vector<1x32xf32> to vector<1x32xbf16>
    %45 = arith.index_cast %c0_i32 : i32 to index
    %c0_47 = arith.constant 0 : index
    %46 = vector.load %arg7[%45, %c0_47] : memref<8x32xf32, #tpu.memory_space<vmem>>, vector<1x32xf32>
    %cst_48 = arith.constant dense<0.000000e+00> : vector<1x32xf32>
    %47 = tpu.matmul %44, %35, %cst_48 {dimension_numbers = #tpu.dot_dimension_numbers<[1], [0], [0], [1], [0, 0, 1, 1], [], []>} : vector<1x32xbf16>, vector<32x32xbf16>, vector<1x32xf32> -> vector<1x32xf32>
    %48 = arith.addf %46, %47 : vector<1x32xf32>
    %49 = arith.index_cast %c0_i32 : i32 to index
    %c0_49 = arith.constant 0 : index
    %50 = vector.load %arg8[%49, %c0_49] : memref<8x32xf32, #tpu.memory_space<vmem>>, vector<1x32xf32>
    %cst_50 = arith.constant dense<0.000000e+00> : vector<1x32xf32>
    %51 = tpu.matmul %44, %37, %cst_50 {dimension_numbers = #tpu.dot_dimension_numbers<[1], [0], [0], [1], [0, 0, 1, 1], [], []>} : vector<1x32xbf16>, vector<32x32xbf16>, vector<1x32xf32> -> vector<1x32xf32>
    %52 = arith.addf %50, %51 : vector<1x32xf32>
    %53 = arith.index_cast %c0_i32 : i32 to index
    %c0_51 = arith.constant 0 : index
    %54 = vector.load %arg9[%53, %c0_51] : memref<8x32xf32, #tpu.memory_space<vmem>>, vector<1x32xf32>
    %cst_52 = arith.constant dense<0.000000e+00> : vector<1x32xf32>
    %55 = tpu.matmul %44, %39, %cst_52 {dimension_numbers = #tpu.dot_dimension_numbers<[1], [0], [0], [1], [0, 0, 1, 1], [], []>} : vector<1x32xbf16>, vector<32x32xbf16>, vector<1x32xf32> -> vector<1x32xf32>
    %56 = arith.addf %54, %55 : vector<1x32xf32>
    %57 = arith.index_cast %c0_i32 : i32 to index
    %c0_53 = arith.constant 0 : index
    %58 = vector.load %arg10[%57, %c0_53] : memref<8x32xf32, #tpu.memory_space<vmem>>, vector<1x32xf32>
    %cst_54 = arith.constant dense<0.000000e+00> : vector<1x32xf32>
    %59 = tpu.matmul %44, %41, %cst_54 {dimension_numbers = #tpu.dot_dimension_numbers<[1], [0], [0], [1], [0, 0, 1, 1], [], []>} : vector<1x32xbf16>, vector<32x32xbf16>, vector<1x32xf32> -> vector<1x32xf32>
    %60 = arith.addf %58, %59 : vector<1x32xf32>
    %61 = arith.negf %48 : vector<1x32xf32>
    %62 = math.exp %61 : vector<1x32xf32>
    %cst_55 = arith.constant 1.000000e+00 : f32
    %63 = vector.broadcast %cst_55 : f32 to vector<1x32xf32>
    %64 = arith.addf %63, %62 : vector<1x32xf32>
    %65 = arith.divf %63, %64 : vector<1x32xf32>
    %66 = arith.negf %52 : vector<1x32xf32>
    %67 = math.exp %66 : vector<1x32xf32>
    %cst_56 = arith.constant 1.000000e+00 : f32
    %68 = vector.broadcast %cst_56 : f32 to vector<1x32xf32>
    %69 = arith.addf %68, %67 : vector<1x32xf32>
    %70 = arith.divf %68, %69 : vector<1x32xf32>
    %71 = math.tanh %56 : vector<1x32xf32>
    %72 = arith.negf %60 : vector<1x32xf32>
    %73 = math.exp %72 : vector<1x32xf32>
    %cst_57 = arith.constant 1.000000e+00 : f32
    %74 = vector.broadcast %cst_57 : f32 to vector<1x32xf32>
    %75 = arith.addf %74, %73 : vector<1x32xf32>
    %76 = arith.divf %74, %75 : vector<1x32xf32>
    %77 = arith.mulf %70, %43 : vector<1x32xf32>
    %78 = arith.mulf %65, %71 : vector<1x32xf32>
    %79 = arith.addf %77, %78 : vector<1x32xf32>
    %80 = math.tanh %79 : vector<1x32xf32>
    %81 = arith.mulf %76, %80 : vector<1x32xf32>
    %82 = arith.index_cast %c0_i32 : i32 to index
    %c0_58 = arith.constant 0 : index
    %83 = vector.load %arg11[%82, %c0_58] : memref<8x32xf32, #tpu.memory_space<vmem>>, vector<1x32xf32>
    tpu.vector_store %arg11[%82, %c0_58], %81 {strides = array<i32>} : memref<8x32xf32, #tpu.memory_space<vmem>>, vector<1x32xf32>,
    %c1_i32 = arith.constant 1 : i32
    %84 = arith.truncf %81 : vector<1x32xf32> to vector<1x32xbf16>
    %85 = arith.index_cast %c1_i32 : i32 to index
    %c0_59 = arith.constant 0 : index
    %86 = vector.load %arg7[%85, %c0_59] : memref<8x32xf32, #tpu.memory_space<vmem>>, vector<1x32xf32>
    %cst_60 = arith.constant dense<0.000000e+00> : vector<1x32xf32>
    %87 = tpu.matmul %84, %35, %cst_60 {dimension_numbers = #tpu.dot_dimension_numbers<[1], [0], [0], [1], [0, 0, 1, 1], [], []>} : vector<1x32xbf16>, vector<32x32xbf16>, vector<1x32xf32> -> vector<1x32xf32>
    %88 = arith.addf %86, %87 : vector<1x32xf32>
    %89 = arith.index_cast %c1_i32 : i32 to index
    %c0_61 = arith.constant 0 : index
    %90 = vector.load %arg8[%89, %c0_61] : memref<8x32xf32, #tpu.memory_space<vmem>>, vector<1x32xf32>
    %cst_62 = arith.constant dense<0.000000e+00> : vector<1x32xf32>
    %91 = tpu.matmul %84, %37, %cst_62 {dimension_numbers = #tpu.dot_dimension_numbers<[1], [0], [0], [1], [0, 0, 1, 1], [], []>} : vector<1x32xbf16>, vector<32x32xbf16>, vector<1x32xf32> -> vector<1x32xf32>
    %92 = arith.addf %90, %91 : vector<1x32xf32>
    %93 = arith.index_cast %c1_i32 : i32 to index
    %c0_63 = arith.constant 0 : index
    %94 = vector.load %arg9[%93, %c0_63] : memref<8x32xf32, #tpu.memory_space<vmem>>, vector<1x32xf32>
    %cst_64 = arith.constant dense<0.000000e+00> : vector<1x32xf32>
    %95 = tpu.matmul %84, %39, %cst_64 {dimension_numbers = #tpu.dot_dimension_numbers<[1], [0], [0], [1], [0, 0, 1, 1], [], []>} : vector<1x32xbf16>, vector<32x32xbf16>, vector<1x32xf32> -> vector<1x32xf32>
    %96 = arith.addf %94, %95 : vector<1x32xf32>
    %97 = arith.index_cast %c1_i32 : i32 to index
    %c0_65 = arith.constant 0 : index
    %98 = vector.load %arg10[%97, %c0_65] : memref<8x32xf32, #tpu.memory_space<vmem>>, vector<1x32xf32>
    %cst_66 = arith.constant dense<0.000000e+00> : vector<1x32xf32>
    %99 = tpu.matmul %84, %41, %cst_66 {dimension_numbers = #tpu.dot_dimension_numbers<[1], [0], [0], [1], [0, 0, 1, 1], [], []>} : vector<1x32xbf16>, vector<32x32xbf16>, vector<1x32xf32> -> vector<1x32xf32>
    %100 = arith.addf %98, %99 : vector<1x32xf32>
    %101 = arith.negf %88 : vector<1x32xf32>
    %102 = math.exp %101 : vector<1x32xf32>
    %cst_67 = arith.constant 1.000000e+00 : f32
    %103 = vector.broadcast %cst_67 : f32 to vector<1x32xf32>
    %104 = arith.addf %103, %102 : vector<1x32xf32>
    %105 = arith.divf %103, %104 : vector<1x32xf32>
    %106 = arith.negf %92 : vector<1x32xf32>
    %107 = math.exp %106 : vector<1x32xf32>
    %cst_68 = arith.constant 1.000000e+00 : f32
    %108 = vector.broadcast %cst_68 : f32 to vector<1x32xf32>
    %109 = arith.addf %108, %107 : vector<1x32xf32>
    %110 = arith.divf %108, %109 : vector<1x32xf32>
    %111 = math.tanh %96 : vector<1x32xf32>
    %112 = arith.negf %100 : vector<1x32xf32>
    %113 = math.exp %112 : vector<1x32xf32>
    %cst_69 = arith.constant 1.000000e+00 : f32
    %114 = vector.broadcast %cst_69 : f32 to vector<1x32xf32>
    %115 = arith.addf %114, %113 : vector<1x32xf32>
    %116 = arith.divf %114, %115 : vector<1x32xf32>
    %117 = arith.mulf %110, %79 : vector<1x32xf32>
    %118 = arith.mulf %105, %111 : vector<1x32xf32>
    %119 = arith.addf %117, %118 : vector<1x32xf32>
    %120 = math.tanh %119 : vector<1x32xf32>
    %121 = arith.mulf %116, %120 : vector<1x32xf32>
    %122 = arith.index_cast %c1_i32 : i32 to index
    %c0_70 = arith.constant 0 : index
    %123 = vector.load %arg11[%122, %c0_70] : memref<8x32xf32, #tpu.memory_space<vmem>>, vector<1x32xf32>
    tpu.vector_store %arg11[%122, %c0_70], %121 {strides = array<i32>} : memref<8x32xf32, #tpu.memory_space<vmem>>, vector<1x32xf32>,
    %c2_i32 = arith.constant 2 : i32
    %124 = arith.truncf %121 : vector<1x32xf32> to vector<1x32xbf16>
    %125 = arith.index_cast %c2_i32 : i32 to index
    %c0_71 = arith.constant 0 : index
    %126 = vector.load %arg7[%125, %c0_71] : memref<8x32xf32, #tpu.memory_space<vmem>>, vector<1x32xf32>
    %cst_72 = arith.constant dense<0.000000e+00> : vector<1x32xf32>
    %127 = tpu.matmul %124, %35, %cst_72 {dimension_numbers = #tpu.dot_dimension_numbers<[1], [0], [0], [1], [0, 0, 1, 1], [], []>} : vector<1x32xbf16>, vector<32x32xbf16>, vector<1x32xf32> -> vector<1x32xf32>
    %128 = arith.addf %126, %127 : vector<1x32xf32>
    %129 = arith.index_cast %c2_i32 : i32 to index
    %c0_73 = arith.constant 0 : index
    %130 = vector.load %arg8[%129, %c0_73] : memref<8x32xf32, #tpu.memory_space<vmem>>, vector<1x32xf32>
    %cst_74 = arith.constant dense<0.000000e+00> : vector<1x32xf32>
    %131 = tpu.matmul %124, %37, %cst_74 {dimension_numbers = #tpu.dot_dimension_numbers<[1], [0], [0], [1], [0, 0, 1, 1], [], []>} : vector<1x32xbf16>, vector<32x32xbf16>, vector<1x32xf32> -> vector<1x32xf32>
    %132 = arith.addf %130, %131 : vector<1x32xf32>
    %133 = arith.index_cast %c2_i32 : i32 to index
    %c0_75 = arith.constant 0 : index
    %134 = vector.load %arg9[%133, %c0_75] : memref<8x32xf32, #tpu.memory_space<vmem>>, vector<1x32xf32>
    %cst_76 = arith.constant dense<0.000000e+00> : vector<1x32xf32>
    %135 = tpu.matmul %124, %39, %cst_76 {dimension_numbers = #tpu.dot_dimension_numbers<[1], [0], [0], [1], [0, 0, 1, 1], [], []>} : vector<1x32xbf16>, vector<32x32xbf16>, vector<1x32xf32> -> vector<1x32xf32>
    %136 = arith.addf %134, %135 : vector<1x32xf32>
    %137 = arith.index_cast %c2_i32 : i32 to index
    %c0_77 = arith.constant 0 : index
    %138 = vector.load %arg10[%137, %c0_77] : memref<8x32xf32, #tpu.memory_space<vmem>>, vector<1x32xf32>
    %cst_78 = arith.constant dense<0.000000e+00> : vector<1x32xf32>
    %139 = tpu.matmul %124, %41, %cst_78 {dimension_numbers = #tpu.dot_dimension_numbers<[1], [0], [0], [1], [0, 0, 1, 1], [], []>} : vector<1x32xbf16>, vector<32x32xbf16>, vector<1x32xf32> -> vector<1x32xf32>
    %140 = arith.addf %138, %139 : vector<1x32xf32>
    %141 = arith.negf %128 : vector<1x32xf32>
    %142 = math.exp %141 : vector<1x32xf32>
    %cst_79 = arith.constant 1.000000e+00 : f32
    %143 = vector.broadcast %cst_79 : f32 to vector<1x32xf32>
    %144 = arith.addf %143, %142 : vector<1x32xf32>
    %145 = arith.divf %143, %144 : vector<1x32xf32>
    %146 = arith.negf %132 : vector<1x32xf32>
    %147 = math.exp %146 : vector<1x32xf32>
    %cst_80 = arith.constant 1.000000e+00 : f32
    %148 = vector.broadcast %cst_80 : f32 to vector<1x32xf32>
    %149 = arith.addf %148, %147 : vector<1x32xf32>
    %150 = arith.divf %148, %149 : vector<1x32xf32>
    %151 = math.tanh %136 : vector<1x32xf32>
    %152 = arith.negf %140 : vector<1x32xf32>
    %153 = math.exp %152 : vector<1x32xf32>
    %cst_81 = arith.constant 1.000000e+00 : f32
    %154 = vector.broadcast %cst_81 : f32 to vector<1x32xf32>
    %155 = arith.addf %154, %153 : vector<1x32xf32>
    %156 = arith.divf %154, %155 : vector<1x32xf32>
    %157 = arith.mulf %150, %119 : vector<1x32xf32>
    %158 = arith.mulf %145, %151 : vector<1x32xf32>
    %159 = arith.addf %157, %158 : vector<1x32xf32>
    %160 = math.tanh %159 : vector<1x32xf32>
    %161 = arith.mulf %156, %160 : vector<1x32xf32>
    %162 = arith.index_cast %c2_i32 : i32 to index
    %c0_82 = arith.constant 0 : index
    %163 = vector.load %arg11[%162, %c0_82] : memref<8x32xf32, #tpu.memory_space<vmem>>, vector<1x32xf32>
    tpu.vector_store %arg11[%162, %c0_82], %161 {strides = array<i32>} : memref<8x32xf32, #tpu.memory_space<vmem>>, vector<1x32xf32>,
    %c3_i32 = arith.constant 3 : i32
    %164 = arith.truncf %161 : vector<1x32xf32> to vector<1x32xbf16>
    %165 = arith.index_cast %c3_i32 : i32 to index
    %c0_83 = arith.constant 0 : index
    %166 = vector.load %arg7[%165, %c0_83] : memref<8x32xf32, #tpu.memory_space<vmem>>, vector<1x32xf32>
    %cst_84 = arith.constant dense<0.000000e+00> : vector<1x32xf32>
    %167 = tpu.matmul %164, %35, %cst_84 {dimension_numbers = #tpu.dot_dimension_numbers<[1], [0], [0], [1], [0, 0, 1, 1], [], []>} : vector<1x32xbf16>, vector<32x32xbf16>, vector<1x32xf32> -> vector<1x32xf32>
    %168 = arith.addf %166, %167 : vector<1x32xf32>
    %169 = arith.index_cast %c3_i32 : i32 to index
    %c0_85 = arith.constant 0 : index
    %170 = vector.load %arg8[%169, %c0_85] : memref<8x32xf32, #tpu.memory_space<vmem>>, vector<1x32xf32>
    %cst_86 = arith.constant dense<0.000000e+00> : vector<1x32xf32>
    %171 = tpu.matmul %164, %37, %cst_86 {dimension_numbers = #tpu.dot_dimension_numbers<[1], [0], [0], [1], [0, 0, 1, 1], [], []>} : vector<1x32xbf16>, vector<32x32xbf16>, vector<1x32xf32> -> vector<1x32xf32>
    %172 = arith.addf %170, %171 : vector<1x32xf32>
    %173 = arith.index_cast %c3_i32 : i32 to index
    %c0_87 = arith.constant 0 : index
    %174 = vector.load %arg9[%173, %c0_87] : memref<8x32xf32, #tpu.memory_space<vmem>>, vector<1x32xf32>
    %cst_88 = arith.constant dense<0.000000e+00> : vector<1x32xf32>
    %175 = tpu.matmul %164, %39, %cst_88 {dimension_numbers = #tpu.dot_dimension_numbers<[1], [0], [0], [1], [0, 0, 1, 1], [], []>} : vector<1x32xbf16>, vector<32x32xbf16>, vector<1x32xf32> -> vector<1x32xf32>
    %176 = arith.addf %174, %175 : vector<1x32xf32>
    %177 = arith.index_cast %c3_i32 : i32 to index
    %c0_89 = arith.constant 0 : index
    %178 = vector.load %arg10[%177, %c0_89] : memref<8x32xf32, #tpu.memory_space<vmem>>, vector<1x32xf32>
    %cst_90 = arith.constant dense<0.000000e+00> : vector<1x32xf32>
    %179 = tpu.matmul %164, %41, %cst_90 {dimension_numbers = #tpu.dot_dimension_numbers<[1], [0], [0], [1], [0, 0, 1, 1], [], []>} : vector<1x32xbf16>, vector<32x32xbf16>, vector<1x32xf32> -> vector<1x32xf32>
    %180 = arith.addf %178, %179 : vector<1x32xf32>
    %181 = arith.negf %168 : vector<1x32xf32>
    %182 = math.exp %181 : vector<1x32xf32>
    %cst_91 = arith.constant 1.000000e+00 : f32
    %183 = vector.broadcast %cst_91 : f32 to vector<1x32xf32>
    %184 = arith.addf %183, %182 : vector<1x32xf32>
    %185 = arith.divf %183, %184 : vector<1x32xf32>
    %186 = arith.negf %172 : vector<1x32xf32>
    %187 = math.exp %186 : vector<1x32xf32>
    %cst_92 = arith.constant 1.000000e+00 : f32
    %188 = vector.broadcast %cst_92 : f32 to vector<1x32xf32>
    %189 = arith.addf %188, %187 : vector<1x32xf32>
    %190 = arith.divf %188, %189 : vector<1x32xf32>
    %191 = math.tanh %176 : vector<1x32xf32>
    %192 = arith.negf %180 : vector<1x32xf32>
    %193 = math.exp %192 : vector<1x32xf32>
    %cst_93 = arith.constant 1.000000e+00 : f32
    %194 = vector.broadcast %cst_93 : f32 to vector<1x32xf32>
    %195 = arith.addf %194, %193 : vector<1x32xf32>
    %196 = arith.divf %194, %195 : vector<1x32xf32>
    %197 = arith.mulf %190, %159 : vector<1x32xf32>
    %198 = arith.mulf %185, %191 : vector<1x32xf32>
    %199 = arith.addf %197, %198 : vector<1x32xf32>
    %200 = math.tanh %199 : vector<1x32xf32>
    %201 = arith.mulf %196, %200 : vector<1x32xf32>
    %202 = arith.index_cast %c3_i32 : i32 to index
    %c0_94 = arith.constant 0 : index
    %203 = vector.load %arg11[%202, %c0_94] : memref<8x32xf32, #tpu.memory_space<vmem>>, vector<1x32xf32>
    tpu.vector_store %arg11[%202, %c0_94], %201 {strides = array<i32>} : memref<8x32xf32, #tpu.memory_space<vmem>>, vector<1x32xf32>,
    %c4_i32 = arith.constant 4 : i32
    %204 = arith.truncf %201 : vector<1x32xf32> to vector<1x32xbf16>
    %205 = arith.index_cast %c4_i32 : i32 to index
    %c0_95 = arith.constant 0 : index
    %206 = vector.load %arg7[%205, %c0_95] : memref<8x32xf32, #tpu.memory_space<vmem>>, vector<1x32xf32>
    %cst_96 = arith.constant dense<0.000000e+00> : vector<1x32xf32>
    %207 = tpu.matmul %204, %35, %cst_96 {dimension_numbers = #tpu.dot_dimension_numbers<[1], [0], [0], [1], [0, 0, 1, 1], [], []>} : vector<1x32xbf16>, vector<32x32xbf16>, vector<1x32xf32> -> vector<1x32xf32>
    %208 = arith.addf %206, %207 : vector<1x32xf32>
    %209 = arith.index_cast %c4_i32 : i32 to index
    %c0_97 = arith.constant 0 : index
    %210 = vector.load %arg8[%209, %c0_97] : memref<8x32xf32, #tpu.memory_space<vmem>>, vector<1x32xf32>
    %cst_98 = arith.constant dense<0.000000e+00> : vector<1x32xf32>
    %211 = tpu.matmul %204, %37, %cst_98 {dimension_numbers = #tpu.dot_dimension_numbers<[1], [0], [0], [1], [0, 0, 1, 1], [], []>} : vector<1x32xbf16>, vector<32x32xbf16>, vector<1x32xf32> -> vector<1x32xf32>
    %212 = arith.addf %210, %211 : vector<1x32xf32>
    %213 = arith.index_cast %c4_i32 : i32 to index
    %c0_99 = arith.constant 0 : index
    %214 = vector.load %arg9[%213, %c0_99] : memref<8x32xf32, #tpu.memory_space<vmem>>, vector<1x32xf32>
    %cst_100 = arith.constant dense<0.000000e+00> : vector<1x32xf32>
    %215 = tpu.matmul %204, %39, %cst_100 {dimension_numbers = #tpu.dot_dimension_numbers<[1], [0], [0], [1], [0, 0, 1, 1], [], []>} : vector<1x32xbf16>, vector<32x32xbf16>, vector<1x32xf32> -> vector<1x32xf32>
    %216 = arith.addf %214, %215 : vector<1x32xf32>
    %217 = arith.index_cast %c4_i32 : i32 to index
    %c0_101 = arith.constant 0 : index
    %218 = vector.load %arg10[%217, %c0_101] : memref<8x32xf32, #tpu.memory_space<vmem>>, vector<1x32xf32>
    %cst_102 = arith.constant dense<0.000000e+00> : vector<1x32xf32>
    %219 = tpu.matmul %204, %41, %cst_102 {dimension_numbers = #tpu.dot_dimension_numbers<[1], [0], [0], [1], [0, 0, 1, 1], [], []>} : vector<1x32xbf16>, vector<32x32xbf16>, vector<1x32xf32> -> vector<1x32xf32>
    %220 = arith.addf %218, %219 : vector<1x32xf32>
    %221 = arith.negf %208 : vector<1x32xf32>
    %222 = math.exp %221 : vector<1x32xf32>
    %cst_103 = arith.constant 1.000000e+00 : f32
    %223 = vector.broadcast %cst_103 : f32 to vector<1x32xf32>
    %224 = arith.addf %223, %222 : vector<1x32xf32>
    %225 = arith.divf %223, %224 : vector<1x32xf32>
    %226 = arith.negf %212 : vector<1x32xf32>
    %227 = math.exp %226 : vector<1x32xf32>
    %cst_104 = arith.constant 1.000000e+00 : f32
    %228 = vector.broadcast %cst_104 : f32 to vector<1x32xf32>
    %229 = arith.addf %228, %227 : vector<1x32xf32>
    %230 = arith.divf %228, %229 : vector<1x32xf32>
    %231 = math.tanh %216 : vector<1x32xf32>
    %232 = arith.negf %220 : vector<1x32xf32>
    %233 = math.exp %232 : vector<1x32xf32>
    %cst_105 = arith.constant 1.000000e+00 : f32
    %234 = vector.broadcast %cst_105 : f32 to vector<1x32xf32>
    %235 = arith.addf %234, %233 : vector<1x32xf32>
    %236 = arith.divf %234, %235 : vector<1x32xf32>
    %237 = arith.mulf %230, %199 : vector<1x32xf32>
    %238 = arith.mulf %225, %231 : vector<1x32xf32>
    %239 = arith.addf %237, %238 : vector<1x32xf32>
    %240 = math.tanh %239 : vector<1x32xf32>
    %241 = arith.mulf %236, %240 : vector<1x32xf32>
    %242 = arith.index_cast %c4_i32 : i32 to index
    %c0_106 = arith.constant 0 : index
    %243 = vector.load %arg11[%242, %c0_106] : memref<8x32xf32, #tpu.memory_space<vmem>>, vector<1x32xf32>
    tpu.vector_store %arg11[%242, %c0_106], %241 {strides = array<i32>} : memref<8x32xf32, #tpu.memory_space<vmem>>, vector<1x32xf32>,
    %c5_i32 = arith.constant 5 : i32
    %244 = arith.truncf %241 : vector<1x32xf32> to vector<1x32xbf16>
    %245 = arith.index_cast %c5_i32 : i32 to index
    %c0_107 = arith.constant 0 : index
    %246 = vector.load %arg7[%245, %c0_107] : memref<8x32xf32, #tpu.memory_space<vmem>>, vector<1x32xf32>
    %cst_108 = arith.constant dense<0.000000e+00> : vector<1x32xf32>
    %247 = tpu.matmul %244, %35, %cst_108 {dimension_numbers = #tpu.dot_dimension_numbers<[1], [0], [0], [1], [0, 0, 1, 1], [], []>} : vector<1x32xbf16>, vector<32x32xbf16>, vector<1x32xf32> -> vector<1x32xf32>
    %248 = arith.addf %246, %247 : vector<1x32xf32>
    %249 = arith.index_cast %c5_i32 : i32 to index
    %c0_109 = arith.constant 0 : index
    %250 = vector.load %arg8[%249, %c0_109] : memref<8x32xf32, #tpu.memory_space<vmem>>, vector<1x32xf32>
    %cst_110 = arith.constant dense<0.000000e+00> : vector<1x32xf32>
    %251 = tpu.matmul %244, %37, %cst_110 {dimension_numbers = #tpu.dot_dimension_numbers<[1], [0], [0], [1], [0, 0, 1, 1], [], []>} : vector<1x32xbf16>, vector<32x32xbf16>, vector<1x32xf32> -> vector<1x32xf32>
    %252 = arith.addf %250, %251 : vector<1x32xf32>
    %253 = arith.index_cast %c5_i32 : i32 to index
    %c0_111 = arith.constant 0 : index
    %254 = vector.load %arg9[%253, %c0_111] : memref<8x32xf32, #tpu.memory_space<vmem>>, vector<1x32xf32>
    %cst_112 = arith.constant dense<0.000000e+00> : vector<1x32xf32>
    %255 = tpu.matmul %244, %39, %cst_112 {dimension_numbers = #tpu.dot_dimension_numbers<[1], [0], [0], [1], [0, 0, 1, 1], [], []>} : vector<1x32xbf16>, vector<32x32xbf16>, vector<1x32xf32> -> vector<1x32xf32>
    %256 = arith.addf %254, %255 : vector<1x32xf32>
    %257 = arith.index_cast %c5_i32 : i32 to index
    %c0_113 = arith.constant 0 : index
    %258 = vector.load %arg10[%257, %c0_113] : memref<8x32xf32, #tpu.memory_space<vmem>>, vector<1x32xf32>
    %cst_114 = arith.constant dense<0.000000e+00> : vector<1x32xf32>
    %259 = tpu.matmul %244, %41, %cst_114 {dimension_numbers = #tpu.dot_dimension_numbers<[1], [0], [0], [1], [0, 0, 1, 1], [], []>} : vector<1x32xbf16>, vector<32x32xbf16>, vector<1x32xf32> -> vector<1x32xf32>
    %260 = arith.addf %258, %259 : vector<1x32xf32>
    %261 = arith.negf %248 : vector<1x32xf32>
    %262 = math.exp %261 : vector<1x32xf32>
    %cst_115 = arith.constant 1.000000e+00 : f32
    %263 = vector.broadcast %cst_115 : f32 to vector<1x32xf32>
    %264 = arith.addf %263, %262 : vector<1x32xf32>
    %265 = arith.divf %263, %264 : vector<1x32xf32>
    %266 = arith.negf %252 : vector<1x32xf32>
    %267 = math.exp %266 : vector<1x32xf32>
    %cst_116 = arith.constant 1.000000e+00 : f32
    %268 = vector.broadcast %cst_116 : f32 to vector<1x32xf32>
    %269 = arith.addf %268, %267 : vector<1x32xf32>
    %270 = arith.divf %268, %269 : vector<1x32xf32>
    %271 = math.tanh %256 : vector<1x32xf32>
    %272 = arith.negf %260 : vector<1x32xf32>
    %273 = math.exp %272 : vector<1x32xf32>
    %cst_117 = arith.constant 1.000000e+00 : f32
    %274 = vector.broadcast %cst_117 : f32 to vector<1x32xf32>
    %275 = arith.addf %274, %273 : vector<1x32xf32>
    %276 = arith.divf %274, %275 : vector<1x32xf32>
    %277 = arith.mulf %270, %239 : vector<1x32xf32>
    %278 = arith.mulf %265, %271 : vector<1x32xf32>
    %279 = arith.addf %277, %278 : vector<1x32xf32>
    %280 = math.tanh %279 : vector<1x32xf32>
    %281 = arith.mulf %276, %280 : vector<1x32xf32>
    %282 = arith.index_cast %c5_i32 : i32 to index
    %c0_118 = arith.constant 0 : index
    %283 = vector.load %arg11[%282, %c0_118] : memref<8x32xf32, #tpu.memory_space<vmem>>, vector<1x32xf32>
    tpu.vector_store %arg11[%282, %c0_118], %281 {strides = array<i32>} : memref<8x32xf32, #tpu.memory_space<vmem>>, vector<1x32xf32>,
    %c6_i32 = arith.constant 6 : i32
    %284 = arith.truncf %281 : vector<1x32xf32> to vector<1x32xbf16>
    %285 = arith.index_cast %c6_i32 : i32 to index
    %c0_119 = arith.constant 0 : index
    %286 = vector.load %arg7[%285, %c0_119] : memref<8x32xf32, #tpu.memory_space<vmem>>, vector<1x32xf32>
    %cst_120 = arith.constant dense<0.000000e+00> : vector<1x32xf32>
    %287 = tpu.matmul %284, %35, %cst_120 {dimension_numbers = #tpu.dot_dimension_numbers<[1], [0], [0], [1], [0, 0, 1, 1], [], []>} : vector<1x32xbf16>, vector<32x32xbf16>, vector<1x32xf32> -> vector<1x32xf32>
    %288 = arith.addf %286, %287 : vector<1x32xf32>
    %289 = arith.index_cast %c6_i32 : i32 to index
    %c0_121 = arith.constant 0 : index
    %290 = vector.load %arg8[%289, %c0_121] : memref<8x32xf32, #tpu.memory_space<vmem>>, vector<1x32xf32>
    %cst_122 = arith.constant dense<0.000000e+00> : vector<1x32xf32>
    %291 = tpu.matmul %284, %37, %cst_122 {dimension_numbers = #tpu.dot_dimension_numbers<[1], [0], [0], [1], [0, 0, 1, 1], [], []>} : vector<1x32xbf16>, vector<32x32xbf16>, vector<1x32xf32> -> vector<1x32xf32>
    %292 = arith.addf %290, %291 : vector<1x32xf32>
    %293 = arith.index_cast %c6_i32 : i32 to index
    %c0_123 = arith.constant 0 : index
    %294 = vector.load %arg9[%293, %c0_123] : memref<8x32xf32, #tpu.memory_space<vmem>>, vector<1x32xf32>
    %cst_124 = arith.constant dense<0.000000e+00> : vector<1x32xf32>
    %295 = tpu.matmul %284, %39, %cst_124 {dimension_numbers = #tpu.dot_dimension_numbers<[1], [0], [0], [1], [0, 0, 1, 1], [], []>} : vector<1x32xbf16>, vector<32x32xbf16>, vector<1x32xf32> -> vector<1x32xf32>
    %296 = arith.addf %294, %295 : vector<1x32xf32>
    %297 = arith.index_cast %c6_i32 : i32 to index
    %c0_125 = arith.constant 0 : index
    %298 = vector.load %arg10[%297, %c0_125] : memref<8x32xf32, #tpu.memory_space<vmem>>, vector<1x32xf32>
    %cst_126 = arith.constant dense<0.000000e+00> : vector<1x32xf32>
    %299 = tpu.matmul %284, %41, %cst_126 {dimension_numbers = #tpu.dot_dimension_numbers<[1], [0], [0], [1], [0, 0, 1, 1], [], []>} : vector<1x32xbf16>, vector<32x32xbf16>, vector<1x32xf32> -> vector<1x32xf32>
    %300 = arith.addf %298, %299 : vector<1x32xf32>
    %301 = arith.negf %288 : vector<1x32xf32>
    %302 = math.exp %301 : vector<1x32xf32>
    %cst_127 = arith.constant 1.000000e+00 : f32
    %303 = vector.broadcast %cst_127 : f32 to vector<1x32xf32>
    %304 = arith.addf %303, %302 : vector<1x32xf32>
    %305 = arith.divf %303, %304 : vector<1x32xf32>
    %306 = arith.negf %292 : vector<1x32xf32>
    %307 = math.exp %306 : vector<1x32xf32>
    %cst_128 = arith.constant 1.000000e+00 : f32
    %308 = vector.broadcast %cst_128 : f32 to vector<1x32xf32>
    %309 = arith.addf %308, %307 : vector<1x32xf32>
    %310 = arith.divf %308, %309 : vector<1x32xf32>
    %311 = math.tanh %296 : vector<1x32xf32>
    %312 = arith.negf %300 : vector<1x32xf32>
    %313 = math.exp %312 : vector<1x32xf32>
    %cst_129 = arith.constant 1.000000e+00 : f32
    %314 = vector.broadcast %cst_129 : f32 to vector<1x32xf32>
    %315 = arith.addf %314, %313 : vector<1x32xf32>
    %316 = arith.divf %314, %315 : vector<1x32xf32>
    %317 = arith.mulf %310, %279 : vector<1x32xf32>
    %318 = arith.mulf %305, %311 : vector<1x32xf32>
    %319 = arith.addf %317, %318 : vector<1x32xf32>
    %320 = math.tanh %319 : vector<1x32xf32>
    %321 = arith.mulf %316, %320 : vector<1x32xf32>
    %322 = arith.index_cast %c6_i32 : i32 to index
    %c0_130 = arith.constant 0 : index
    %323 = vector.load %arg11[%322, %c0_130] : memref<8x32xf32, #tpu.memory_space<vmem>>, vector<1x32xf32>
    tpu.vector_store %arg11[%322, %c0_130], %321 {strides = array<i32>} : memref<8x32xf32, #tpu.memory_space<vmem>>, vector<1x32xf32>,
    %c7_i32 = arith.constant 7 : i32
    %324 = arith.truncf %321 : vector<1x32xf32> to vector<1x32xbf16>
    %325 = arith.index_cast %c7_i32 : i32 to index
    %c0_131 = arith.constant 0 : index
    %326 = vector.load %arg7[%325, %c0_131] : memref<8x32xf32, #tpu.memory_space<vmem>>, vector<1x32xf32>
    %cst_132 = arith.constant dense<0.000000e+00> : vector<1x32xf32>
    %327 = tpu.matmul %324, %35, %cst_132 {dimension_numbers = #tpu.dot_dimension_numbers<[1], [0], [0], [1], [0, 0, 1, 1], [], []>} : vector<1x32xbf16>, vector<32x32xbf16>, vector<1x32xf32> -> vector<1x32xf32>
    %328 = arith.addf %326, %327 : vector<1x32xf32>
    %329 = arith.index_cast %c7_i32 : i32 to index
    %c0_133 = arith.constant 0 : index
    %330 = vector.load %arg8[%329, %c0_133] : memref<8x32xf32, #tpu.memory_space<vmem>>, vector<1x32xf32>
    %cst_134 = arith.constant dense<0.000000e+00> : vector<1x32xf32>
    %331 = tpu.matmul %324, %37, %cst_134 {dimension_numbers = #tpu.dot_dimension_numbers<[1], [0], [0], [1], [0, 0, 1, 1], [], []>} : vector<1x32xbf16>, vector<32x32xbf16>, vector<1x32xf32> -> vector<1x32xf32>
    %332 = arith.addf %330, %331 : vector<1x32xf32>
    %333 = arith.index_cast %c7_i32 : i32 to index
    %c0_135 = arith.constant 0 : index
    %334 = vector.load %arg9[%333, %c0_135] : memref<8x32xf32, #tpu.memory_space<vmem>>, vector<1x32xf32>
    %cst_136 = arith.constant dense<0.000000e+00> : vector<1x32xf32>
    %335 = tpu.matmul %324, %39, %cst_136 {dimension_numbers = #tpu.dot_dimension_numbers<[1], [0], [0], [1], [0, 0, 1, 1], [], []>} : vector<1x32xbf16>, vector<32x32xbf16>, vector<1x32xf32> -> vector<1x32xf32>
    %336 = arith.addf %334, %335 : vector<1x32xf32>
    %337 = arith.index_cast %c7_i32 : i32 to index
    %c0_137 = arith.constant 0 : index
    %338 = vector.load %arg10[%337, %c0_137] : memref<8x32xf32, #tpu.memory_space<vmem>>, vector<1x32xf32>
    %cst_138 = arith.constant dense<0.000000e+00> : vector<1x32xf32>
    %339 = tpu.matmul %324, %41, %cst_138 {dimension_numbers = #tpu.dot_dimension_numbers<[1], [0], [0], [1], [0, 0, 1, 1], [], []>} : vector<1x32xbf16>, vector<32x32xbf16>, vector<1x32xf32> -> vector<1x32xf32>
    %340 = arith.addf %338, %339 : vector<1x32xf32>
    %341 = arith.negf %328 : vector<1x32xf32>
    %342 = math.exp %341 : vector<1x32xf32>
    %cst_139 = arith.constant 1.000000e+00 : f32
    %343 = vector.broadcast %cst_139 : f32 to vector<1x32xf32>
    %344 = arith.addf %343, %342 : vector<1x32xf32>
    %345 = arith.divf %343, %344 : vector<1x32xf32>
    %346 = arith.negf %332 : vector<1x32xf32>
    %347 = math.exp %346 : vector<1x32xf32>
    %cst_140 = arith.constant 1.000000e+00 : f32
    %348 = vector.broadcast %cst_140 : f32 to vector<1x32xf32>
    %349 = arith.addf %348, %347 : vector<1x32xf32>
    %350 = arith.divf %348, %349 : vector<1x32xf32>
    %351 = math.tanh %336 : vector<1x32xf32>
    %352 = arith.negf %340 : vector<1x32xf32>
    %353 = math.exp %352 : vector<1x32xf32>
    %cst_141 = arith.constant 1.000000e+00 : f32
    %354 = vector.broadcast %cst_141 : f32 to vector<1x32xf32>
    %355 = arith.addf %354, %353 : vector<1x32xf32>
    %356 = arith.divf %354, %355 : vector<1x32xf32>
    %357 = arith.mulf %350, %319 : vector<1x32xf32>
    %358 = arith.mulf %345, %351 : vector<1x32xf32>
    %359 = arith.addf %357, %358 : vector<1x32xf32>
    %360 = math.tanh %359 : vector<1x32xf32>
    %361 = arith.mulf %356, %360 : vector<1x32xf32>
    %362 = arith.index_cast %c7_i32 : i32 to index
    %c0_142 = arith.constant 0 : index
    %363 = vector.load %arg11[%362, %c0_142] : memref<8x32xf32, #tpu.memory_space<vmem>>, vector<1x32xf32>
    tpu.vector_store %arg11[%362, %c0_142], %361 {strides = array<i32>} : memref<8x32xf32, #tpu.memory_space<vmem>>, vector<1x32xf32>,
    %c8_i32 = arith.constant 8 : i32
    %c0_143 = arith.constant 0 : index
    %c0_144 = arith.constant 0 : index
    %364 = vector.load %arg11[%c0_143, %c0_144] : memref<8x32xf32, #tpu.memory_space<vmem>>, vector<8x32xf32>
    %365 = arith.truncf %364 : vector<8x32xf32> to vector<8x32xbf16>
    %c0_145 = arith.constant 0 : index
    %c0_146 = arith.constant 0 : index
    %366 = vector.load %arg4[%c0_145, %c0_146] : memref<32x4xbf16, #tpu.memory_space<vmem>>, vector<32x4xbf16>
    %cst_147 = arith.constant dense<0.000000e+00> : vector<8x4xf32>
    %367 = tpu.matmul %365, %366, %cst_147 {dimension_numbers = #tpu.dot_dimension_numbers<[1], [0], [0], [1], [0, 0, 1, 1], [], []>} : vector<8x32xbf16>, vector<32x4xbf16>, vector<8x4xf32> -> vector<8x4xf32>
    %c0_148 = arith.constant 0 : index
    %c0_149 = arith.constant 0 : index
    %368 = vector.load %arg5[%c0_148, %c0_149] : memref<1x4xf32, #tpu.memory_space<vmem>>, vector<1x4xf32>
    %369 = vector.broadcast %368 : vector<1x4xf32> to vector<8x4xf32>
    %370 = arith.addf %367, %369 : vector<8x4xf32>
    %c0_150 = arith.constant 0 : index
    %c0_151 = arith.constant 0 : index
    %371 = vector.load %arg6[%c0_150, %c0_151] : memref<8x4xf32, #tpu.memory_space<vmem>>, vector<8x4xf32>
    tpu.vector_store %arg6[%c0_150, %c0_151], %370 {strides = array<i32>} : memref<8x4xf32, #tpu.memory_space<vmem>>, vector<8x4xf32>,
    return
  }
}

</mosaic_0001>

<bundles_post_ra>
// kernel: tpu_custom_call.1
= control target key start
LH: loop header
LB: loop body
LE: loop exit
PB: predicated region body
PF: predicated region fallthrough
CT: control target
= control target key end

     0   :  { %11 = vsyncpa [#allocation8], 0  ;;  %s3069_s0 = inlined_call_operand.vmem [shape: f32[8,16], index: 0, kind: input, shape index: {}]   ;;  %s3070_s1 = inlined_call_operand.hbm [shape: bf16[4,16,32], index: 1, kind: input, shape index: {}]   ;;  %s3071_s2 = inlined_call_operand.hbm [shape: bf16[4,32,32], index: 2, kind: input, shape index: {}]   ;;  %s3072_s3 = inlined_call_operand.vmem [shape: f32[4,1,32], index: 3, kind: input, shape index: {}]   ;;  %s3073_s4 = inlined_call_operand.vmem [shape: bf16[32,4], index: 4, kind: input, shape index: {}]   ;;  %s3074_s5 = inlined_call_operand.vmem [shape: f32[1,4], index: 5, kind: input, shape index: {}]   ;;  %s3075_s6 = inlined_call_operand.vmem [shape: f32[8,4], index: 6, kind: output, shape index: {}]  }
   0x1   :  { %12 = vsyncpa [#allocation10], 0  ;;  %s2687_s21 = smov [#allocation7]   ;;  %s2639_s25 = scalar_lea.hbm %s3070_s1, 512 }
   0x2   :  { %s20_s22 = sshll.u32 %s2687_s21, 4  ;;  %p2640_p0 = scmp.ne.s32.totalorder %s3070_s1, %s2639_s25  ;;  %s21_s22 = int_to_ptr.vmem [resolvable:$true] %s20_s22 }
   0x3   :  { %p2643_p1 = scmp.lt.u32.totalorder %s2639_s25, %s3070_s1 }
   0x5   :  { %p2645_p2 = pnand %p2643_p1, %p2640_p0 }
   0x7   :  { %2648 = shalt.err (!%p2645_p2)
}
   0x8   :  { %s2649_s30 = scalar_lea.vmem %s21_s22, 512  ;;  %p2654_p4 = scmp.lt.s32.totalorder %s21_s22, %s21_s22 }
   0x9   :  { %p2650_p3 = scmp.ne.s32.totalorder %s21_s22, %s2649_s30  ;;  %p2655_p5 = scmp.lt.s32.totalorder %s2649_s30, %s2649_s30 }
   0xb   :  { %p2656_p6 = por %p2655_p5, %p2654_p4 }
   0xd   :  { %p2657_p7 = pnand %p2656_p6, %p2650_p3 }
   0xf   :  { %2660 = shalt.err (!%p2657_p7)
}
  0x10   :  { %s2688_s7 = smov 64   ;;  %s2689_s8 = smov 4  }
  0x11   :  { %26 = dma.hbm_to_vmem [thread:$0]  %s3070_s1, 512, %s21_s22, [#allocation8], %s2688_s7, %s2688_s7, %s2689_s8  }
  0x12   :  { %s2690_s11 = smov [#allocation9]   ;;  %s2661_s15 = scalar_lea.hbm %s3071_s2, 1024 }
  0x13   :  { %s32_s12 = sshll.u32 %s2690_s11, 4  ;;  %p2662_p8 = scmp.ne.s32.totalorder %s3071_s2, %s2661_s15  ;;  %s33_s12 = int_to_ptr.vmem [resolvable:$true] %s32_s12 }
  0x14   :  { %p2665_p9 = scmp.lt.u32.totalorder %s2661_s15, %s3071_s2 }
  0x16   :  { %p2667_p10 = pnand %p2665_p9, %p2662_p8 }
  0x18   :  { %2670 = shalt.err (!%p2667_p10)
}
  0x19   :  { %s2671_s20 = scalar_lea.vmem %s33_s12, 1024  ;;  %p2676_p12 = scmp.lt.s32.totalorder %s33_s12, %s33_s12 }
  0x1a   :  { %p2672_p11 = scmp.ne.s32.totalorder %s33_s12, %s2671_s20  ;;  %p2677_p13 = scmp.lt.s32.totalorder %s2671_s20, %s2671_s20 }
  0x1c   :  { %p2678_p0 = por %p2677_p13, %p2676_p12 }
  0x1e   :  { %p2679_p1 = pnand %p2678_p0, %p2672_p11 }
  0x20   :  { %2682 = shalt.err (!%p2679_p1)
}
  0x21   :  { %38 = dma.hbm_to_vmem [thread:$0]  %s3071_s2, 1024, %s33_s12, [#allocation10], %s2688_s7, %s2688_s7, %s2689_s8  }
  0x22   :  { %2683 = dma.done.wait [#allocation8], 512  }
  0x23   :  { %2684 = vsyncadd [#allocation8], 4294966784 }
  0x24   :  { %2685 = dma.done.wait [#allocation10], 1024  }
  0x25   :  { %2686 = vsyncadd [#allocation10], 4294966272  ;;  %v2691_v0 = vmov 0.0   ;;  %vm2692_vm0 = vmmov 0   ;;  %v2489_v1 = vld [vmem:[#allocation7] sm:$0xff]   ;;  %v2490_v2 = vld [vmem:[#allocation7 + $0x8] sm:$0xff]  }
  0x26   :  { %2194 = vmatprep.subr.bf16.mxu0 %v2691_v0  ;;  %2200 = vmatprep.subr.bf16.mxu1 %v2691_v0  ;;  %v52_v3 = vld [vmem:[%s3069_s0] sm:$0xff]  ;;  %vm69_vm1 = vcmask 130048   ;;  %v2491_v5 = vld [vmem:[#allocation7 + $0x10] sm:$0xff]   ;;  %v2772_v7 = vld [vmem:[#allocation9] sm:$0xff]   ;;  %v2693_v13 = vmov 0   ;;  %vm113_vm2 = vcmask 261120  }
  0x27   :  { %2196 = vmatprep.mubr.msk.bf16.mxu0 %vm2692_vm0, %v2691_v0  ;;  %2202 = vmatprep.mubr.msk.bf16.mxu1 %vm2692_vm0, %v2691_v0  ;;  %v53_v4 = vpack.c.bf16 %v52_v3, %v52_v3  ;;  %v2492_v6 = vld [vmem:[#allocation7 + $0x18] sm:$0xff]   ;;  %v2774_v8 = vld [vmem:[#allocation9 + $0x10] sm:$0xff]   ;;  %v2779_v9 = vld [vmem:[#allocation9 + $0x8] sm:$0xff]   ;;  %vm551_vm3 = vcmask 253952   ;;  %vm2000_vm4 = vcmask 31744  }
  0x28   :  { %2195 = vmatpush3.bf16.msra.mxu0 %v2489_v1  ;;  %2201 = vmatpush3.bf16.msra.mxu1 %v2490_v2  ;;  %v2783_v10 = vld [vmem:[#allocation9 + $0x18] sm:$0xff]   ;;  %v2791_v11 = vld [vmem:[#allocation9 + $0x20] sm:$0xff]   ;;  %v2795_v12 = vld [vmem:[#allocation9 + $0x30] sm:$0xff]  }
  0x29   :  { %2206 = vmatprep.subr.bf16.mxu0 %v2691_v0  ;;  %2212 = vmatprep.subr.bf16.mxu1 %v2691_v0  ;;  %v2799_v14 = vld [vmem:[#allocation9 + $0x28] sm:$0xff]   ;;  %v2803_v15 = vld [vmem:[#allocation9 + $0x38] sm:$0xff]  }
  0x2a   :  { %v2008_v16 = vld [vmem:[%s3072_s3] ss:$0 sm:$0xff]  ;;  %v2012_v17 = vld [vmem:[%s3072_s3 + $0x1] ss:$0 sm:$0xff]  ;;  %v2016_v28 = vld [vmem:[%s3072_s3 + $0x2] ss:$0 sm:$0xff] }
  0x2b   :  { %2197 = vmatmul.mubr.msk.bf16.vlgmr.msra.gmra.mrb[0].mxu0 %vm69_vm1, %v53_v4  ;;  %2203 = vmatmul.mubr.msk.bf16.vlgmr.msra.gmra.mrb[0].mxu1 %vm69_vm1, %v53_v4  ;;  %v2020_v29 = vld [vmem:[%s3072_s3 + $0x3] ss:$0 sm:$0xff] }
  0x2c   :  { %2207 = vmatpush3.bf16.msra.mxu0 %v2491_v5  ;;  %2213 = vmatpush3.bf16.msra.mxu1 %v2492_v6 }
  0x2d   :  { %2208 = vmatprep.mubr.msk.bf16.mxu0 %vm2692_vm0, %v2691_v0  ;;  %2214 = vmatprep.mubr.msk.bf16.mxu1 %vm2692_vm0, %v2691_v0 }
  0x2e   :  { %2218 = vmatprep.subr.bf16.mxu0 %v2691_v0  ;;  %2226 = vmatprep.subr.bf16.mxu1 %v2691_v0 }
  0x33   :  { %2209 = vmatmul.mubr.msk.bf16.vlgmr.msra.gmra.mrb[4].mxu0 %vm69_vm1, %v53_v4  ;;  %2215 = vmatmul.mubr.msk.bf16.vlgmr.msra.gmra.mrb[4].mxu1 %vm69_vm1, %v53_v4 }
  0x34   :  { %2219 = vmatpush3.bf16.msra.mxu0 %v2772_v7  ;;  %2227 = vmatpush3.bf16.msra.mxu1 %v2774_v8 }
  0x35   :  { %2220 = vmatprep.subr.bf16.mxu0 %v2691_v0  ;;  %2228 = vmatprep.subr.bf16.mxu1 %v2691_v0 }
  0x36   :  { %2222 = vmatprep.mubr.msk.bf16.mxu0 %vm2692_vm0, %v2691_v0  ;;  %2230 = vmatprep.mubr.msk.bf16.mxu1 %vm2692_vm0, %v2691_v0 }
  0x38   :  { %2221 = vmatpush3.bf16.msra.mxu0 %v2779_v9  ;;  %2229 = vmatpush3.bf16.msra.mxu1 %v2783_v10 }
  0x39   :  { %2234 = vmatprep.subr.bf16.mxu0 %v2691_v0  ;;  %2242 = vmatprep.subr.bf16.mxu1 %v2691_v0 }
  0x3b   :  { %2223 = vmatmul.mubr.bf16.vlgmr.msra.gmra.mrb[8].mxu0 %v2693_v13  ;;  %2231 = vmatmul.mubr.bf16.vlgmr.msra.gmra.mrb[8].mxu1 %v2693_v13 }
  0x3c   :  { %2235 = vmatpush3.bf16.msra.mxu0 %v2791_v11  ;;  %2243 = vmatpush3.bf16.msra.mxu1 %v2795_v12 }
  0x3d   :  { %2236 = vmatprep.subr.bf16.mxu0 %v2691_v0  ;;  %2244 = vmatprep.subr.bf16.mxu1 %v2691_v0 }
  0x3e   :  { %2238 = vmatprep.mubr.msk.bf16.mxu0 %vm2692_vm0, %v2691_v0  ;;  %2246 = vmatprep.mubr.msk.bf16.mxu1 %vm2692_vm0, %v2691_v0 }
  0x40   :  { %2237 = vmatpush3.bf16.msra.mxu0 %v2799_v14  ;;  %2245 = vmatpush3.bf16.msra.mxu1 %v2803_v15 }
  0x41   :  { %2250 = vmatprep.subr.bf16.mxu0 %v2691_v0  ;;  %2258 = vmatprep.subr.bf16.mxu1 %v2691_v0 }
  0x43   :  { %2239 = vmatmul.mubr.bf16.vlgmr.msra.gmra.mrb[12].mxu0 %v2693_v13  ;;  %2247 = vmatmul.mubr.bf16.vlgmr.msra.gmra.mrb[12].mxu1 %v2693_v13 }
  0x44   :  { %2251 = vmatpush3.bf16.msra.mxu0 %v2772_v7  ;;  %2259 = vmatpush3.bf16.msra.mxu1 %v2774_v8 }
  0x45   :  { %2252 = vmatprep.subr.bf16.mxu0 %v2691_v0  ;;  %2260 = vmatprep.subr.bf16.mxu1 %v2691_v0 }
  0x46   :  { %2254 = vmatprep.mubr.msk.bf16.mxu0 %vm2692_vm0, %v2691_v0  ;;  %2262 = vmatprep.mubr.msk.bf16.mxu1 %vm2692_vm0, %v2691_v0 }
  0x48   :  { %2253 = vmatpush3.bf16.msra.mxu0 %v2779_v9  ;;  %2261 = vmatpush3.bf16.msra.mxu1 %v2783_v10 }
  0x49   :  { %2266 = vmatprep.subr.bf16.mxu0 %v2691_v0  ;;  %2274 = vmatprep.subr.bf16.mxu1 %v2691_v0 }
  0xfe   :  { %v107_v18 = vpop.f32.mrb[0].mxu0  ;;  %v166_v20 = vpop.f32.mrb[0].mxu1 }
  0xff   :  { %v108_v19 = vadd.f32 %v2008_v16, %v107_v18  ;;  %v2198_v21 = vpop.f32.mrb[1].mxu0  ;;  %v167_v22 = vadd.f32 %v2012_v17, %v166_v20  ;;  %v2204_v23 = vpop.f32.mrb[1].mxu1 }
 0x100   :  { %v110_v24 = vpop.f32.mrb[2].mxu0  ;;  %v169_v25 = vpop.f32.mrb[2].mxu1 }
 0x101   :  { %114 = vst.msk [vmem:[#allocation2] sm:$0xff] %vm113_vm2, %v108_v19  ;;  %v2199_v26 = vpop.f32.mrb[3].mxu0  ;;  %172 = vst.msk [vmem:[#allocation3] sm:$0xff] %vm113_vm2, %v167_v22  ;;  %v2205_v27 = vpop.f32.mrb[3].mxu1 }
 0x106   :  { %v224_v30 = vpop.f32.mrb[4].mxu0  ;;  %v282_v32 = vpop.f32.mrb[4].mxu1 }
 0x107   :  { %v225_v31 = vadd.f32 %v2016_v28, %v224_v30  ;;  %v2210_v33 = vpop.f32.mrb[5].mxu0  ;;  %v283_v34 = vadd.f32 %v2020_v29, %v282_v32  ;;  %v2216_v35 = vpop.f32.mrb[5].mxu1 }
 0x108   :  { %v227_v36 = vpop.f32.mrb[6].mxu0  ;;  %v285_v37 = vpop.f32.mrb[6].mxu1  ;;  %v308_v40 = vld [vmem:[#allocation2] sm:$0x1]  ;;  %v365_v43 = vld [vmem:[#allocation3] sm:$0x1] }
 0x109   :  { %230 = vst.msk [vmem:[#allocation4] sm:$0xff] %vm113_vm2, %v225_v31  ;;  %v2211_v38 = vpop.f32.mrb[7].mxu0  ;;  %288 = vst.msk [vmem:[#allocation5] sm:$0xff] %vm113_vm2, %v283_v34  ;;  %v2217_v39 = vpop.f32.mrb[7].mxu1  ;;  %v554_v28 = vld [vmem:[#allocation2 + $0x1] sm:$0x1] }
 0x10a   :  { %v599_v30 = vld [vmem:[#allocation3 + $0x1] sm:$0x1] }
 0x10e   :  { %v358_v41 = vpop.f32.mrb[8].mxu0  ;;  %v412_v44 = vpop.f32.mrb[8].mxu1 }
 0x10f   :  { %v364_v42 = vadd.f32 %v358_v41, %v308_v40  ;;  %v2224_v45 = vpop.f32.mrb[9].mxu0  ;;  %v418_v46 = vadd.f32 %v412_v44, %v365_v43  ;;  %v2232_v47 = vpop.f32.mrb[9].mxu1 }
 0x110   :  { %v361_v48 = vpop.f32.mrb[10].mxu0  ;;  %v415_v50 = vpop.f32.mrb[10].mxu1  ;;  %v473_v55 = vld [vmem:[#allocation5] sm:$0x1]  ;;  %v419_v63 = vld [vmem:[#allocation4] sm:$0x1] }
 0x111   :  { %v2031_v49 = vmul.f32 -1.442695, %v364_v42  ;;  %v2225_v51 = vpop.f32.mrb[11].mxu0  ;;  %v2032_v52 = vmul.f32 -1.442695, %v418_v46  ;;  %v2233_v53 = vpop.f32.mrb[11].mxu1 }
 0x112   :  { %v683_v43 = vld [vmem:[#allocation5 + $0x1] sm:$0x1] }
 0x113   :  { %2503 = vpow2.f32 %v2031_v49 }
 0x114   :  { %2505 = vpow2.f32 %v2032_v52  ;;  %v641_v52 = vld [vmem:[#allocation4 + $0x1] sm:$0x1] }
 0x116   :  { %v466_v54 = vpop.f32.mrb[12].mxu0  ;;  %v520_v56 = vpop.f32.mrb[12].mxu1 }
 0x117   :  { %v2240_v57 = vpop.f32.mrb[13].mxu0  ;;  %v526_v58 = vadd.f32 %v520_v56, %v473_v55  ;;  %v2248_v59 = vpop.f32.mrb[13].mxu1  ;;  %v472_v3 = vadd.f32 %v466_v54, %v419_v63 }
 0x118   :  { %v469_v60 = vpop.f32.mrb[14].mxu0  ;;  %v523_v61 = vpop.f32.mrb[14].mxu1 }
 0x119   :  { %v2241_v62 = vpop.f32.mrb[15].mxu0  ;;  %v2033_v1 = vmul.f32 -1.442695, %v526_v58  ;;  %v2249_v2 = vpop.f32.mrb[15].mxu1 }
 0x11b   :  { %2507 = vpow2.f32 %v2033_v1 }
 0x11c   :  { %2509 = vtanh.f32 %v472_v3 }
 0x11d   :  { %v2504_v4 = vpop.eup %2503 }
 0x11e   :  { %v2506_v5 = vpop.eup %2505  ;;  %v530_v6 = vadd.f32 1.0, %v2504_v4 }
 0x11f   :  { %v536_v13 = vadd.f32 1.0, %v2506_v5 }
 0x120   :  { %2511 = vrcp.f32 %v530_v6 }
 0x121   :  { %2513 = vrcp.f32 %v536_v13 }
 0x125   :  { %v2508_v16 = vpop.eup %2507 }
 0x126   :  { %v2510_v17 = vpop.eup %2509  ;;  %v543_v21 = vadd.f32 1.0, %v2508_v16  ;;  %v751_v16 = vld [vmem:[#allocation2 + $0x2] sm:$0x1] }
 0x128   :  { %2515 = vrcp.f32 %v543_v21 }
 0x12a   :  { %v2512_v18 = vpop.eup %2511 }
 0x12b   :  { %v2514_v19 = vpop.eup %2513  ;;  %v547_v20 = vmul.f32 %v2512_v18, %v2510_v17  ;;  %v796_v18 = vld [vmem:[#allocation3 + $0x2] sm:$0x1] }
 0x12c   :  { %v546_v22 = vmul.f32 0.0, %v2514_v19 }
 0x12e   :  { %v2842_v23 = vadd.f32 %v547_v20, %v546_v22 }
 0x130   :  { %2517 = vtanh.f32 %v2842_v23 }
 0x132   :  { %v2516_v24 = vpop.eup %2515 }
 0x13a   :  { %v2518_v25 = vpop.eup %2517 }
 0x13b   :  { %v550_v26 = vmul.f32 %v2518_v25, %v2516_v24 }
 0x13d   :  { %552 = vst.msk [vmem:[#allocation6] sm:$0x1] %vm551_vm3, %v550_v26  ;;  %v553_v27 = vpack.c.bf16 %v550_v26, %v550_v26 }
 0x13f   :  { %2255 = vmatmul.mubr.msk.bf16.vlgmr.msra.gmra.mrb[16].mxu0 %vm113_vm2, %v553_v27  ;;  %2263 = vmatmul.mubr.msk.bf16.vlgmr.msra.gmra.mrb[16].mxu1 %vm113_vm2, %v553_v27 }
 0x140   :  { %2267 = vmatpush3.bf16.msra.mxu0 %v2791_v11  ;;  %2275 = vmatpush3.bf16.msra.mxu1 %v2795_v12 }
 0x141   :  { %2268 = vmatprep.subr.bf16.mxu0 %v2691_v0  ;;  %2276 = vmatprep.subr.bf16.mxu1 %v2691_v0 }
 0x142   :  { %2270 = vmatprep.mubr.msk.bf16.mxu0 %vm2692_vm0, %v2691_v0  ;;  %2278 = vmatprep.mubr.msk.bf16.mxu1 %vm2692_vm0, %v2691_v0 }
 0x144   :  { %2269 = vmatpush3.bf16.msra.mxu0 %v2799_v14  ;;  %2277 = vmatpush3.bf16.msra.mxu1 %v2803_v15 }
 0x145   :  { %2282 = vmatprep.subr.bf16.mxu0 %v2691_v0  ;;  %2290 = vmatprep.subr.bf16.mxu1 %v2691_v0 }
 0x147   :  { %2271 = vmatmul.mubr.msk.bf16.vlgmr.msra.gmra.mrb[20].mxu0 %vm113_vm2, %v553_v27  ;;  %2279 = vmatmul.mubr.msk.bf16.vlgmr.msra.gmra.mrb[20].mxu1 %vm113_vm2, %v553_v27 }
 0x148   :  { %2283 = vmatpush3.bf16.msra.mxu0 %v2772_v7  ;;  %2291 = vmatpush3.bf16.msra.mxu1 %v2774_v8 }
 0x149   :  { %2284 = vmatprep.subr.bf16.mxu0 %v2691_v0  ;;  %2292 = vmatprep.subr.bf16.mxu1 %v2691_v0 }
 0x14a   :  { %2286 = vmatprep.mubr.msk.bf16.mxu0 %vm2692_vm0, %v2691_v0  ;;  %2294 = vmatprep.mubr.msk.bf16.mxu1 %vm2692_vm0, %v2691_v0 }
 0x14c   :  { %2285 = vmatpush3.bf16.msra.mxu0 %v2779_v9  ;;  %2293 = vmatpush3.bf16.msra.mxu1 %v2783_v10 }
 0x14d   :  { %2298 = vmatprep.subr.bf16.mxu0 %v2691_v0  ;;  %2306 = vmatprep.subr.bf16.mxu1 %v2691_v0 }
 0x212   :  { %v592_v29 = vpop.f32.mrb[16].mxu0  ;;  %v634_v31 = vpop.f32.mrb[16].mxu1 }
 0x213   :  { %v598_v32 = vadd.f32 %v592_v29, %v554_v28  ;;  %v640_v33 = vadd.f32 %v634_v31, %v599_v30  ;;  %v2256_v34 = vpop.f32.mrb[17].mxu0  ;;  %v2264_v35 = vpop.f32.mrb[17].mxu1  ;;  %v880_v31 = vld [vmem:[#allocation5 + $0x2] sm:$0x1] }
 0x214   :  { %v595_v36 = vpop.f32.mrb[18].mxu0  ;;  %v637_v37 = vpop.f32.mrb[18].mxu1 }
 0x215   :  { %v2038_v38 = vmul.f32 -1.442695, %v598_v32  ;;  %v2039_v39 = vmul.f32 -1.442695, %v640_v33  ;;  %v2257_v40 = vpop.f32.mrb[19].mxu0  ;;  %v2265_v41 = vpop.f32.mrb[19].mxu1 }
 0x216   :  { %v838_v40 = vld [vmem:[#allocation4 + $0x2] sm:$0x1] }
 0x217   :  { %2519 = vpow2.f32 %v2038_v38 }
 0x218   :  { %2521 = vpow2.f32 %v2039_v39 }
 0x21a   :  { %v676_v42 = vpop.f32.mrb[20].mxu0  ;;  %v718_v44 = vpop.f32.mrb[20].mxu1 }
 0x21b   :  { %v724_v45 = vadd.f32 %v718_v44, %v683_v43  ;;  %v2272_v46 = vpop.f32.mrb[21].mxu0  ;;  %v2280_v47 = vpop.f32.mrb[21].mxu1  ;;  %v682_v54 = vadd.f32 %v676_v42, %v641_v52 }
 0x21c   :  { %v679_v48 = vpop.f32.mrb[22].mxu0  ;;  %v721_v49 = vpop.f32.mrb[22].mxu1 }
 0x21d   :  { %v2273_v50 = vpop.f32.mrb[23].mxu0  ;;  %v2281_v51 = vpop.f32.mrb[23].mxu1  ;;  %v2040_v53 = vmul.f32 -1.442695, %v724_v45 }
 0x21f   :  { %2523 = vpow2.f32 %v2040_v53 }
 0x220   :  { %2525 = vtanh.f32 %v682_v54 }
 0x221   :  { %v2520_v55 = vpop.eup %2519 }
 0x222   :  { %v2522_v56 = vpop.eup %2521  ;;  %v728_v57 = vadd.f32 1.0, %v2520_v55 }
 0x223   :  { %v734_v58 = vadd.f32 1.0, %v2522_v56 }
 0x224   :  { %2527 = vrcp.f32 %v728_v57 }
 0x225   :  { %2529 = vrcp.f32 %v734_v58 }
 0x229   :  { %v2524_v59 = vpop.eup %2523 }
 0x22a   :  { %v2526_v60 = vpop.eup %2525  ;;  %v741_v1 = vadd.f32 1.0, %v2524_v59  ;;  %v948_v59 = vld [vmem:[#allocation2 + $0x3] sm:$0x1] }
 0x22c   :  { %2531 = vrcp.f32 %v741_v1 }
 0x22e   :  { %v2528_v61 = vpop.eup %2527 }
 0x22f   :  { %v2530_v62 = vpop.eup %2529  ;;  %v745_v63 = vmul.f32 %v2528_v61, %v2526_v60  ;;  %v993_v61 = vld [vmem:[#allocation3 + $0x3] sm:$0x1] }
 0x230   :  { %v744_v2 = vmul.f32 %v2530_v62, %v2842_v23 }
 0x232   :  { %v2875_v3 = vadd.f32 %v745_v63, %v744_v2 }
 0x234   :  { %2533 = vtanh.f32 %v2875_v3 }
 0x236   :  { %v2532_v4 = vpop.eup %2531 }
 0x23e   :  { %v2534_v5 = vpop.eup %2533 }
 0x23f   :  { %v748_v6 = vmul.f32 %v2534_v5, %v2532_v4 }
 0x241   :  { %749 = vst.msk [vmem:[#allocation6 + $0x1] sm:$0x1] %vm551_vm3, %v748_v6  ;;  %v750_v13 = vpack.c.bf16 %v748_v6, %v748_v6 }
 0x243   :  { %2287 = vmatmul.mubr.msk.bf16.vlgmr.msra.gmra.mrb[24].mxu0 %vm113_vm2, %v750_v13  ;;  %2295 = vmatmul.mubr.msk.bf16.vlgmr.msra.gmra.mrb[24].mxu1 %vm113_vm2, %v750_v13 }
 0x244   :  { %2299 = vmatpush3.bf16.msra.mxu0 %v2791_v11  ;;  %2307 = vmatpush3.bf16.msra.mxu1 %v2795_v12 }
 0x245   :  { %2300 = vmatprep.subr.bf16.mxu0 %v2691_v0  ;;  %2308 = vmatprep.subr.bf16.mxu1 %v2691_v0 }
 0x246   :  { %2302 = vmatprep.mubr.msk.bf16.mxu0 %vm2692_vm0, %v2691_v0  ;;  %2310 = vmatprep.mubr.msk.bf16.mxu1 %vm2692_vm0, %v2691_v0 }
 0x248   :  { %2301 = vmatpush3.bf16.msra.mxu0 %v2799_v14  ;;  %2309 = vmatpush3.bf16.msra.mxu1 %v2803_v15 }
 0x249   :  { %2314 = vmatprep.subr.bf16.mxu0 %v2691_v0  ;;  %2322 = vmatprep.subr.bf16.mxu1 %v2691_v0 }
 0x24b   :  { %2303 = vmatmul.mubr.msk.bf16.vlgmr.msra.gmra.mrb[28].mxu0 %vm113_vm2, %v750_v13  ;;  %2311 = vmatmul.mubr.msk.bf16.vlgmr.msra.gmra.mrb[28].mxu1 %vm113_vm2, %v750_v13 }
 0x24c   :  { %2315 = vmatpush3.bf16.msra.mxu0 %v2772_v7  ;;  %2323 = vmatpush3.bf16.msra.mxu1 %v2774_v8 }
 0x24d   :  { %2316 = vmatprep.subr.bf16.mxu0 %v2691_v0  ;;  %2324 = vmatprep.subr.bf16.mxu1 %v2691_v0 }
 0x24e   :  { %2318 = vmatprep.mubr.msk.bf16.mxu0 %vm2692_vm0, %v2691_v0  ;;  %2326 = vmatprep.mubr.msk.bf16.mxu1 %vm2692_vm0, %v2691_v0 }
 0x250   :  { %2317 = vmatpush3.bf16.msra.mxu0 %v2779_v9  ;;  %2325 = vmatpush3.bf16.msra.mxu1 %v2783_v10 }
 0x251   :  { %2330 = vmatprep.subr.bf16.mxu0 %v2691_v0  ;;  %2338 = vmatprep.subr.bf16.mxu1 %v2691_v0 }
 0x316   :  { %v789_v17 = vpop.f32.mrb[24].mxu0  ;;  %v831_v19 = vpop.f32.mrb[24].mxu1 }
 0x317   :  { %v795_v20 = vadd.f32 %v789_v17, %v751_v16  ;;  %v837_v21 = vadd.f32 %v831_v19, %v796_v18  ;;  %v2288_v22 = vpop.f32.mrb[25].mxu0  ;;  %v2296_v23 = vpop.f32.mrb[25].mxu1  ;;  %v1077_v19 = vld [vmem:[#allocation5 + $0x3] sm:$0x1] }
 0x318   :  { %v792_v24 = vpop.f32.mrb[26].mxu0  ;;  %v834_v25 = vpop.f32.mrb[26].mxu1 }
 0x319   :  { %v2045_v26 = vmul.f32 -1.442695, %v795_v20  ;;  %v2046_v27 = vmul.f32 -1.442695, %v837_v21  ;;  %v2289_v28 = vpop.f32.mrb[27].mxu0  ;;  %v2297_v29 = vpop.f32.mrb[27].mxu1 }
 0x31a   :  { %v1035_v28 = vld [vmem:[#allocation4 + $0x3] sm:$0x1] }
 0x31b   :  { %2535 = vpow2.f32 %v2045_v26 }
 0x31c   :  { %2537 = vpow2.f32 %v2046_v27 }
 0x31e   :  { %v873_v30 = vpop.f32.mrb[28].mxu0  ;;  %v915_v32 = vpop.f32.mrb[28].mxu1 }
 0x31f   :  { %v921_v33 = vadd.f32 %v915_v32, %v880_v31  ;;  %v2304_v34 = vpop.f32.mrb[29].mxu0  ;;  %v2312_v35 = vpop.f32.mrb[29].mxu1  ;;  %v879_v42 = vadd.f32 %v873_v30, %v838_v40 }
 0x320   :  { %v876_v36 = vpop.f32.mrb[30].mxu0  ;;  %v918_v37 = vpop.f32.mrb[30].mxu1 }
 0x321   :  { %v2305_v38 = vpop.f32.mrb[31].mxu0  ;;  %v2313_v39 = vpop.f32.mrb[31].mxu1  ;;  %v2047_v41 = vmul.f32 -1.442695, %v921_v33 }
 0x323   :  { %2539 = vpow2.f32 %v2047_v41 }
 0x324   :  { %2541 = vtanh.f32 %v879_v42 }
 0x325   :  { %v2536_v43 = vpop.eup %2535 }
 0x326   :  { %v2538_v44 = vpop.eup %2537  ;;  %v925_v45 = vadd.f32 1.0, %v2536_v43 }
 0x327   :  { %v931_v46 = vadd.f32 1.0, %v2538_v44 }
 0x328   :  { %2543 = vrcp.f32 %v925_v45 }
 0x329   :  { %2545 = vrcp.f32 %v931_v46 }
 0x32d   :  { %v2540_v47 = vpop.eup %2539 }
 0x32e   :  { %v2542_v48 = vpop.eup %2541  ;;  %v938_v52 = vadd.f32 1.0, %v2540_v47  ;;  %v1145_v47 = vld [vmem:[#allocation2 + $0x4] sm:$0x1] }
 0x330   :  { %2547 = vrcp.f32 %v938_v52 }
 0x332   :  { %v2544_v49 = vpop.eup %2543 }
 0x333   :  { %v2546_v50 = vpop.eup %2545  ;;  %v942_v51 = vmul.f32 %v2544_v49, %v2542_v48  ;;  %v1190_v49 = vld [vmem:[#allocation3 + $0x4] sm:$0x1] }
 0x334   :  { %v941_v53 = vmul.f32 %v2546_v50, %v2875_v3 }
 0x336   :  { %v2908_v54 = vadd.f32 %v942_v51, %v941_v53 }
 0x338   :  { %2549 = vtanh.f32 %v2908_v54 }
 0x33a   :  { %v2548_v55 = vpop.eup %2547 }
 0x342   :  { %v2550_v56 = vpop.eup %2549 }
 0x343   :  { %v945_v57 = vmul.f32 %v2550_v56, %v2548_v55 }
 0x345   :  { %946 = vst.msk [vmem:[#allocation6 + $0x2] sm:$0x1] %vm551_vm3, %v945_v57  ;;  %v947_v58 = vpack.c.bf16 %v945_v57, %v945_v57 }
 0x347   :  { %2319 = vmatmul.mubr.msk.bf16.vlgmr.msra.gmra.mrb[32].mxu0 %vm113_vm2, %v947_v58  ;;  %2327 = vmatmul.mubr.msk.bf16.vlgmr.msra.gmra.mrb[32].mxu1 %vm113_vm2, %v947_v58 }
 0x348   :  { %2331 = vmatpush3.bf16.msra.mxu0 %v2791_v11  ;;  %2339 = vmatpush3.bf16.msra.mxu1 %v2795_v12 }
 0x349   :  { %2332 = vmatprep.subr.bf16.mxu0 %v2691_v0  ;;  %2340 = vmatprep.subr.bf16.mxu1 %v2691_v0 }
 0x34a   :  { %2334 = vmatprep.mubr.msk.bf16.mxu0 %vm2692_vm0, %v2691_v0  ;;  %2342 = vmatprep.mubr.msk.bf16.mxu1 %vm2692_vm0, %v2691_v0 }
 0x34c   :  { %2333 = vmatpush3.bf16.msra.mxu0 %v2799_v14  ;;  %2341 = vmatpush3.bf16.msra.mxu1 %v2803_v15 }
 0x34d   :  { %2346 = vmatprep.subr.bf16.mxu0 %v2691_v0  ;;  %2354 = vmatprep.subr.bf16.mxu1 %v2691_v0 }
 0x34f   :  { %2335 = vmatmul.mubr.msk.bf16.vlgmr.msra.gmra.mrb[36].mxu0 %vm113_vm2, %v947_v58  ;;  %2343 = vmatmul.mubr.msk.bf16.vlgmr.msra.gmra.mrb[36].mxu1 %vm113_vm2, %v947_v58 }
 0x350   :  { %2347 = vmatpush3.bf16.msra.mxu0 %v2772_v7  ;;  %2355 = vmatpush3.bf16.msra.mxu1 %v2774_v8 }
 0x351   :  { %2348 = vmatprep.subr.bf16.mxu0 %v2691_v0  ;;  %2356 = vmatprep.subr.bf16.mxu1 %v2691_v0 }
 0x352   :  { %2350 = vmatprep.mubr.msk.bf16.mxu0 %vm2692_vm0, %v2691_v0  ;;  %2358 = vmatprep.mubr.msk.bf16.mxu1 %vm2692_vm0, %v2691_v0 }
 0x354   :  { %2349 = vmatpush3.bf16.msra.mxu0 %v2779_v9  ;;  %2357 = vmatpush3.bf16.msra.mxu1 %v2783_v10 }
 0x355   :  { %2362 = vmatprep.subr.bf16.mxu0 %v2691_v0  ;;  %2370 = vmatprep.subr.bf16.mxu1 %v2691_v0 }
 0x41a   :  { %v986_v60 = vpop.f32.mrb[32].mxu0  ;;  %v1028_v62 = vpop.f32.mrb[32].mxu1 }
 0x41b   :  { %v992_v63 = vadd.f32 %v986_v60, %v948_v59  ;;  %v1034_v1 = vadd.f32 %v1028_v62, %v993_v61  ;;  %v2320_v2 = vpop.f32.mrb[33].mxu0  ;;  %v2328_v3 = vpop.f32.mrb[33].mxu1  ;;  %v1274_v62 = vld [vmem:[#allocation5 + $0x4] sm:$0x1] }
 0x41c   :  { %v989_v4 = vpop.f32.mrb[34].mxu0  ;;  %v1031_v5 = vpop.f32.mrb[34].mxu1 }
 0x41d   :  { %v2052_v6 = vmul.f32 -1.442695, %v992_v63  ;;  %v2053_v13 = vmul.f32 -1.442695, %v1034_v1  ;;  %v2321_v16 = vpop.f32.mrb[35].mxu0  ;;  %v2329_v17 = vpop.f32.mrb[35].mxu1 }
 0x41e   :  { %v1232_v16 = vld [vmem:[#allocation4 + $0x4] sm:$0x1] }
 0x41f   :  { %2551 = vpow2.f32 %v2052_v6 }
 0x420   :  { %2553 = vpow2.f32 %v2053_v13 }
 0x422   :  { %v1070_v18 = vpop.f32.mrb[36].mxu0  ;;  %v1112_v20 = vpop.f32.mrb[36].mxu1 }
 0x423   :  { %v1118_v21 = vadd.f32 %v1112_v20, %v1077_v19  ;;  %v2336_v22 = vpop.f32.mrb[37].mxu0  ;;  %v2344_v23 = vpop.f32.mrb[37].mxu1  ;;  %v1076_v30 = vadd.f32 %v1070_v18, %v1035_v28 }
 0x424   :  { %v1073_v24 = vpop.f32.mrb[38].mxu0  ;;  %v1115_v25 = vpop.f32.mrb[38].mxu1 }
 0x425   :  { %v2337_v26 = vpop.f32.mrb[39].mxu0  ;;  %v2345_v27 = vpop.f32.mrb[39].mxu1  ;;  %v2054_v29 = vmul.f32 -1.442695, %v1118_v21 }
 0x427   :  { %2555 = vpow2.f32 %v2054_v29 }
 0x428   :  { %2557 = vtanh.f32 %v1076_v30 }
 0x429   :  { %v2552_v31 = vpop.eup %2551 }
 0x42a   :  { %v2554_v32 = vpop.eup %2553  ;;  %v1122_v33 = vadd.f32 1.0, %v2552_v31 }
 0x42b   :  { %v1128_v34 = vadd.f32 1.0, %v2554_v32 }
 0x42c   :  { %2559 = vrcp.f32 %v1122_v33 }
 0x42d   :  { %2561 = vrcp.f32 %v1128_v34 }
 0x431   :  { %v2556_v35 = vpop.eup %2555 }
 0x432   :  { %v2558_v36 = vpop.eup %2557  ;;  %v1135_v40 = vadd.f32 1.0, %v2556_v35  ;;  %v1387_v35 = vld [vmem:[#allocation3 + $0x5] sm:$0x1] }
 0x434   :  { %2563 = vrcp.f32 %v1135_v40 }
 0x436   :  { %v2560_v37 = vpop.eup %2559 }
 0x437   :  { %v2562_v38 = vpop.eup %2561  ;;  %v1139_v39 = vmul.f32 %v2560_v37, %v2558_v36 }
 0x438   :  { %v1138_v41 = vmul.f32 %v2562_v38, %v2908_v54 }
 0x43a   :  { %v2941_v42 = vadd.f32 %v1139_v39, %v1138_v41 }
 0x43c   :  { %2565 = vtanh.f32 %v2941_v42 }
 0x43e   :  { %v2564_v43 = vpop.eup %2563 }
 0x446   :  { %v2566_v44 = vpop.eup %2565 }
 0x447   :  { %v1142_v45 = vmul.f32 %v2566_v44, %v2564_v43 }
 0x449   :  { %1143 = vst.msk [vmem:[#allocation6 + $0x3] sm:$0x1] %vm551_vm3, %v1142_v45  ;;  %v1144_v46 = vpack.c.bf16 %v1142_v45, %v1142_v45 }
 0x44b   :  { %2351 = vmatmul.mubr.msk.bf16.vlgmr.msra.gmra.mrb[40].mxu0 %vm113_vm2, %v1144_v46  ;;  %2359 = vmatmul.mubr.msk.bf16.vlgmr.msra.gmra.mrb[40].mxu1 %vm113_vm2, %v1144_v46 }
 0x44c   :  { %2363 = vmatpush3.bf16.msra.mxu0 %v2791_v11  ;;  %2371 = vmatpush3.bf16.msra.mxu1 %v2795_v12 }
 0x44d   :  { %2364 = vmatprep.subr.bf16.mxu0 %v2691_v0  ;;  %2372 = vmatprep.subr.bf16.mxu1 %v2691_v0 }
 0x44e   :  { %2366 = vmatprep.mubr.msk.bf16.mxu0 %vm2692_vm0, %v2691_v0  ;;  %2374 = vmatprep.mubr.msk.bf16.mxu1 %vm2692_vm0, %v2691_v0 }
 0x450   :  { %2365 = vmatpush3.bf16.msra.mxu0 %v2799_v14  ;;  %2373 = vmatpush3.bf16.msra.mxu1 %v2803_v15 }
 0x451   :  { %2378 = vmatprep.subr.bf16.mxu0 %v2691_v0  ;;  %2386 = vmatprep.subr.bf16.mxu1 %v2691_v0 }
 0x453   :  { %2367 = vmatmul.mubr.msk.bf16.vlgmr.msra.gmra.mrb[44].mxu0 %vm113_vm2, %v1144_v46  ;;  %2375 = vmatmul.mubr.msk.bf16.vlgmr.msra.gmra.mrb[44].mxu1 %vm113_vm2, %v1144_v46  ;;  %v1471_v46 = vld [vmem:[#allocation5 + $0x5] sm:$0x1] }
 0x454   :  { %2379 = vmatpush3.bf16.msra.mxu0 %v2772_v7  ;;  %2387 = vmatpush3.bf16.msra.mxu1 %v2774_v8 }
 0x455   :  { %2380 = vmatprep.subr.bf16.mxu0 %v2691_v0  ;;  %2388 = vmatprep.subr.bf16.mxu1 %v2691_v0 }
 0x456   :  { %2382 = vmatprep.mubr.msk.bf16.mxu0 %vm2692_vm0, %v2691_v0  ;;  %2390 = vmatprep.mubr.msk.bf16.mxu1 %vm2692_vm0, %v2691_v0 }
 0x458   :  { %2381 = vmatpush3.bf16.msra.mxu0 %v2779_v9  ;;  %2389 = vmatpush3.bf16.msra.mxu1 %v2783_v10 }
 0x459   :  { %2394 = vmatprep.subr.bf16.mxu0 %v2691_v0  ;;  %2402 = vmatprep.subr.bf16.mxu1 %v2691_v0 }
 0x51e   :  { %v1183_v48 = vpop.f32.mrb[40].mxu0  ;;  %v1225_v50 = vpop.f32.mrb[40].mxu1 }
 0x51f   :  { %v1189_v51 = vadd.f32 %v1183_v48, %v1145_v47  ;;  %v1231_v52 = vadd.f32 %v1225_v50, %v1190_v49  ;;  %v2352_v53 = vpop.f32.mrb[41].mxu0  ;;  %v2360_v54 = vpop.f32.mrb[41].mxu1 }
 0x520   :  { %v1186_v55 = vpop.f32.mrb[42].mxu0  ;;  %v1228_v56 = vpop.f32.mrb[42].mxu1 }
 0x521   :  { %v2059_v57 = vmul.f32 -1.442695, %v1189_v51  ;;  %v2060_v58 = vmul.f32 -1.442695, %v1231_v52  ;;  %v2353_v59 = vpop.f32.mrb[43].mxu0  ;;  %v2361_v60 = vpop.f32.mrb[43].mxu1 }
 0x522   :  { %v1429_v55 = vld [vmem:[#allocation4 + $0x5] sm:$0x1] }
 0x523   :  { %2567 = vpow2.f32 %v2059_v57 }
 0x524   :  { %2569 = vpow2.f32 %v2060_v58 }
 0x526   :  { %v1267_v61 = vpop.f32.mrb[44].mxu0  ;;  %v1309_v63 = vpop.f32.mrb[44].mxu1 }
 0x527   :  { %v1315_v1 = vadd.f32 %v1309_v63, %v1274_v62  ;;  %v2368_v2 = vpop.f32.mrb[45].mxu0  ;;  %v2376_v3 = vpop.f32.mrb[45].mxu1  ;;  %v1273_v18 = vadd.f32 %v1267_v61, %v1232_v16 }
 0x528   :  { %v1270_v4 = vpop.f32.mrb[46].mxu0  ;;  %v1312_v5 = vpop.f32.mrb[46].mxu1 }
 0x529   :  { %v2369_v6 = vpop.f32.mrb[47].mxu0  ;;  %v2377_v13 = vpop.f32.mrb[47].mxu1  ;;  %v2061_v17 = vmul.f32 -1.442695, %v1315_v1 }
 0x52b   :  { %2571 = vpow2.f32 %v2061_v17 }
 0x52c   :  { %2573 = vtanh.f32 %v1273_v18 }
 0x52d   :  { %v2568_v19 = vpop.eup %2567 }
 0x52e   :  { %v2570_v20 = vpop.eup %2569  ;;  %v1319_v21 = vadd.f32 1.0, %v2568_v19  ;;  %v1539_v19 = vld [vmem:[#allocation2 + $0x6] sm:$0x1] }
 0x52f   :  { %v1325_v22 = vadd.f32 1.0, %v2570_v20 }
 0x530   :  { %2575 = vrcp.f32 %v1319_v21  ;;  %v1584_v21 = vld [vmem:[#allocation3 + $0x6] sm:$0x1] }
 0x531   :  { %2577 = vrcp.f32 %v1325_v22 }
 0x535   :  { %v2572_v23 = vpop.eup %2571 }
 0x536   :  { %v2574_v24 = vpop.eup %2573  ;;  %v1332_v28 = vadd.f32 1.0, %v2572_v23 }
 0x538   :  { %2579 = vrcp.f32 %v1332_v28 }
 0x53a   :  { %v2576_v25 = vpop.eup %2575 }
 0x53b   :  { %v2578_v26 = vpop.eup %2577  ;;  %v1336_v27 = vmul.f32 %v2576_v25, %v2574_v24 }
 0x53c   :  { %v1335_v29 = vmul.f32 %v2578_v26, %v2941_v42 }
 0x53e   :  { %v2974_v30 = vadd.f32 %v1336_v27, %v1335_v29 }
 0x540   :  { %2581 = vtanh.f32 %v2974_v30 }
 0x542   :  { %v2580_v31 = vpop.eup %2579 }
 0x54a   :  { %v2582_v32 = vpop.eup %2581 }
 0x54b   :  { %v1339_v33 = vmul.f32 %v2582_v32, %v2580_v31 }
 0x54d   :  { %1340 = vst.msk [vmem:[#allocation6 + $0x4] sm:$0x1] %vm551_vm3, %v1339_v33  ;;  %v1341_v34 = vpack.c.bf16 %v1339_v33, %v1339_v33 }
 0x54f   :  { %2383 = vmatmul.mubr.msk.bf16.vlgmr.msra.gmra.mrb[48].mxu0 %vm113_vm2, %v1341_v34  ;;  %2391 = vmatmul.mubr.msk.bf16.vlgmr.msra.gmra.mrb[48].mxu1 %vm113_vm2, %v1341_v34 }
 0x550   :  { %2395 = vmatpush3.bf16.msra.mxu0 %v2791_v11  ;;  %2403 = vmatpush3.bf16.msra.mxu1 %v2795_v12 }
 0x551   :  { %2396 = vmatprep.subr.bf16.mxu0 %v2691_v0  ;;  %2404 = vmatprep.subr.bf16.mxu1 %v2691_v0 }
 0x552   :  { %2398 = vmatprep.mubr.msk.bf16.mxu0 %vm2692_vm0, %v2691_v0  ;;  %2406 = vmatprep.mubr.msk.bf16.mxu1 %vm2692_vm0, %v2691_v0 }
 0x554   :  { %2397 = vmatpush3.bf16.msra.mxu0 %v2799_v14  ;;  %2405 = vmatpush3.bf16.msra.mxu1 %v2803_v15 }
 0x555   :  { %2410 = vmatprep.subr.bf16.mxu0 %v2691_v0  ;;  %2418 = vmatprep.subr.bf16.mxu1 %v2691_v0 }
 0x557   :  { %2399 = vmatmul.mubr.msk.bf16.vlgmr.msra.gmra.mrb[52].mxu0 %vm113_vm2, %v1341_v34  ;;  %2407 = vmatmul.mubr.msk.bf16.vlgmr.msra.gmra.mrb[52].mxu1 %vm113_vm2, %v1341_v34  ;;  %v1668_v34 = vld [vmem:[#allocation5 + $0x6] sm:$0x1] }
 0x558   :  { %2411 = vmatpush3.bf16.msra.mxu0 %v2772_v7  ;;  %2419 = vmatpush3.bf16.msra.mxu1 %v2774_v8  ;;  %v1342_v7 = vld [vmem:[#allocation2 + $0x5] sm:$0x1] }
 0x559   :  { %2412 = vmatprep.subr.bf16.mxu0 %v2691_v0  ;;  %2420 = vmatprep.subr.bf16.mxu1 %v2691_v0 }
 0x55a   :  { %2414 = vmatprep.mubr.msk.bf16.mxu0 %vm2692_vm0, %v2691_v0  ;;  %2422 = vmatprep.mubr.msk.bf16.mxu1 %vm2692_vm0, %v2691_v0 }
 0x55c   :  { %2413 = vmatpush3.bf16.msra.mxu0 %v2779_v9  ;;  %2421 = vmatpush3.bf16.msra.mxu1 %v2783_v10 }
 0x55d   :  { %2426 = vmatprep.subr.bf16.mxu0 %v2691_v0  ;;  %2434 = vmatprep.subr.bf16.mxu1 %v2691_v0 }
 0x622   :  { %v1380_v8 = vpop.f32.mrb[48].mxu0  ;;  %v1422_v36 = vpop.f32.mrb[48].mxu1 }
 0x623   :  { %v1386_v37 = vadd.f32 %v1380_v8, %v1342_v7  ;;  %v1428_v38 = vadd.f32 %v1422_v36, %v1387_v35  ;;  %v2384_v39 = vpop.f32.mrb[49].mxu0  ;;  %v2392_v40 = vpop.f32.mrb[49].mxu1 }
 0x624   :  { %v1383_v41 = vpop.f32.mrb[50].mxu0  ;;  %v1425_v42 = vpop.f32.mrb[50].mxu1 }
 0x625   :  { %v2066_v43 = vmul.f32 -1.442695, %v1386_v37  ;;  %v2067_v44 = vmul.f32 -1.442695, %v1428_v38  ;;  %v2385_v45 = vpop.f32.mrb[51].mxu0  ;;  %v2393_v9 = vpop.f32.mrb[51].mxu1 }
 0x626   :  { %v1626_v41 = vld [vmem:[#allocation4 + $0x6] sm:$0x1] }
 0x627   :  { %2583 = vpow2.f32 %v2066_v43 }
 0x628   :  { %2585 = vpow2.f32 %v2067_v44 }
 0x62a   :  { %v1464_v10 = vpop.f32.mrb[52].mxu0  ;;  %v1506_v47 = vpop.f32.mrb[52].mxu1 }
 0x62b   :  { %v1512_v48 = vadd.f32 %v1506_v47, %v1471_v46  ;;  %v2400_v49 = vpop.f32.mrb[53].mxu0  ;;  %v2408_v50 = vpop.f32.mrb[53].mxu1  ;;  %v1470_v57 = vadd.f32 %v1464_v10, %v1429_v55 }
 0x62c   :  { %v1467_v51 = vpop.f32.mrb[54].mxu0  ;;  %v1509_v52 = vpop.f32.mrb[54].mxu1 }
 0x62d   :  { %v2401_v53 = vpop.f32.mrb[55].mxu0  ;;  %v2409_v54 = vpop.f32.mrb[55].mxu1  ;;  %v2068_v56 = vmul.f32 -1.442695, %v1512_v48 }
 0x62f   :  { %2587 = vpow2.f32 %v2068_v56 }
 0x630   :  { %2589 = vtanh.f32 %v1470_v57 }
 0x631   :  { %v2584_v58 = vpop.eup %2583 }
 0x632   :  { %v2586_v59 = vpop.eup %2585  ;;  %v1516_v60 = vadd.f32 1.0, %v2584_v58  ;;  %v2635_v58 = vld [vmem:[#allocation9 + $0x20] sm:$0xff]  }
 0x633   :  { %v1522_v61 = vadd.f32 1.0, %v2586_v59  ;;  %v2636_v59 = vld [vmem:[#allocation9 + $0x30] sm:$0xff]  }
 0x634   :  { %2591 = vrcp.f32 %v1516_v60  ;;  %v2637_v60 = vld [vmem:[#allocation9 + $0x28] sm:$0xff]  }
 0x635   :  { %2593 = vrcp.f32 %v1522_v61  ;;  %v2638_v61 = vld [vmem:[#allocation9 + $0x38] sm:$0xff]  }
 0x639   :  { %v2588_v62 = vpop.eup %2587 }
 0x63a   :  { %v2590_v63 = vpop.eup %2589  ;;  %v1529_v4 = vadd.f32 1.0, %v2588_v62  ;;  %v2501_v62 = vld [vmem:[%s3073_s4] sm:$0xff]  }
 0x63c   :  { %2595 = vrcp.f32 %v1529_v4 }
 0x63e   :  { %v2592_v1 = vpop.eup %2591 }
 0x63f   :  { %v2594_v2 = vpop.eup %2593  ;;  %v1533_v3 = vmul.f32 %v2592_v1, %v2590_v63  ;;  %v2502_v63 = vld [vmem:[%s3073_s4 + $0x8] sm:$0xff]   ;;  %v1736_v1 = vld [vmem:[#allocation2 + $0x7] sm:$0x1] }
 0x640   :  { %v1532_v5 = vmul.f32 %v2594_v2, %v2974_v30 }
 0x642   :  { %v3007_v6 = vadd.f32 %v1533_v3, %v1532_v5  ;;  %v1781_v3 = vld [vmem:[#allocation3 + $0x7] sm:$0x1] }
 0x644   :  { %2597 = vtanh.f32 %v3007_v6 }
 0x646   :  { %v2596_v13 = vpop.eup %2595 }
 0x64e   :  { %v2598_v16 = vpop.eup %2597 }
 0x64f   :  { %v1536_v17 = vmul.f32 %v2598_v16, %v2596_v13 }
 0x651   :  { %1537 = vst.msk [vmem:[#allocation6 + $0x5] sm:$0x1] %vm551_vm3, %v1536_v17  ;;  %v1538_v18 = vpack.c.bf16 %v1536_v17, %v1536_v17 }
 0x653   :  { %2415 = vmatmul.mubr.msk.bf16.vlgmr.msra.gmra.mrb[56].mxu0 %vm113_vm2, %v1538_v18  ;;  %2423 = vmatmul.mubr.msk.bf16.vlgmr.msra.gmra.mrb[56].mxu1 %vm113_vm2, %v1538_v18 }
 0x654   :  { %2427 = vmatpush3.bf16.msra.mxu0 %v2791_v11  ;;  %2435 = vmatpush3.bf16.msra.mxu1 %v2795_v12  ;;  %v2631_v11 = vld [vmem:[#allocation9] sm:$0xff]   ;;  %v2632_v12 = vld [vmem:[#allocation9 + $0x10] sm:$0xff]  }
 0x655   :  { %2428 = vmatprep.subr.bf16.mxu0 %v2691_v0  ;;  %2436 = vmatprep.subr.bf16.mxu1 %v2691_v0 }
 0x656   :  { %2430 = vmatprep.mubr.msk.bf16.mxu0 %vm2692_vm0, %v2691_v0  ;;  %2438 = vmatprep.mubr.msk.bf16.mxu1 %vm2692_vm0, %v2691_v0 }
 0x658   :  { %2429 = vmatpush3.bf16.msra.mxu0 %v2799_v14  ;;  %2437 = vmatpush3.bf16.msra.mxu1 %v2803_v15  ;;  %v2633_v14 = vld [vmem:[#allocation9 + $0x8] sm:$0xff]   ;;  %v2634_v15 = vld [vmem:[#allocation9 + $0x18] sm:$0xff]  }
 0x659   :  { %2442 = vmatprep.subr.bf16.mxu0 %v2691_v0  ;;  %2450 = vmatprep.subr.bf16.mxu1 %v2691_v0 }
 0x65b   :  { %2431 = vmatmul.mubr.msk.bf16.vlgmr.msra.gmra.mrb[60].mxu0 %vm113_vm2, %v1538_v18  ;;  %2439 = vmatmul.mubr.msk.bf16.vlgmr.msra.gmra.mrb[60].mxu1 %vm113_vm2, %v1538_v18 }
 0x65c   :  { %2443 = vmatpush3.bf16.msra.mxu0 %v2631_v11  ;;  %2451 = vmatpush3.bf16.msra.mxu1 %v2632_v12 }
 0x65d   :  { %2444 = vmatprep.subr.bf16.mxu0 %v2691_v0  ;;  %2452 = vmatprep.subr.bf16.mxu1 %v2691_v0 }
 0x65e   :  { %2446 = vmatprep.mubr.msk.bf16.mxu0 %vm2692_vm0, %v2691_v0  ;;  %2454 = vmatprep.mubr.msk.bf16.mxu1 %vm2692_vm0, %v2691_v0 }
 0x660   :  { %2445 = vmatpush3.bf16.msra.mxu0 %v2633_v14  ;;  %2453 = vmatpush3.bf16.msra.mxu1 %v2634_v15 }
 0x661   :  { %2458 = vmatprep.subr.bf16.mxu0 %v2691_v0  ;;  %2466 = vmatprep.subr.bf16.mxu1 %v2691_v0 }
 0x726   :  { %v1577_v20 = vpop.f32.mrb[56].mxu0  ;;  %v1619_v22 = vpop.f32.mrb[56].mxu1 }
 0x727   :  { %v1583_v23 = vadd.f32 %v1577_v20, %v1539_v19  ;;  %v1625_v24 = vadd.f32 %v1619_v22, %v1584_v21  ;;  %v2416_v25 = vpop.f32.mrb[57].mxu0  ;;  %v2424_v26 = vpop.f32.mrb[57].mxu1  ;;  %v1865_v20 = vld [vmem:[#allocation5 + $0x7] sm:$0x1] }
 0x728   :  { %v1580_v27 = vpop.f32.mrb[58].mxu0  ;;  %v1622_v28 = vpop.f32.mrb[58].mxu1 }
 0x729   :  { %v2073_v29 = vmul.f32 -1.442695, %v1583_v23  ;;  %v2074_v30 = vmul.f32 -1.442695, %v1625_v24  ;;  %v2417_v31 = vpop.f32.mrb[59].mxu0  ;;  %v2425_v32 = vpop.f32.mrb[59].mxu1 }
 0x72a   :  { %v1823_v28 = vld [vmem:[#allocation4 + $0x7] sm:$0x1] }
 0x72b   :  { %2599 = vpow2.f32 %v2073_v29 }
 0x72c   :  { %2601 = vpow2.f32 %v2074_v30 }
 0x72e   :  { %v1661_v33 = vpop.f32.mrb[60].mxu0  ;;  %v1703_v7 = vpop.f32.mrb[60].mxu1 }
 0x72f   :  { %v1709_v8 = vadd.f32 %v1703_v7, %v1668_v34  ;;  %v2432_v35 = vpop.f32.mrb[61].mxu0  ;;  %v2440_v36 = vpop.f32.mrb[61].mxu1  ;;  %v1667_v43 = vadd.f32 %v1661_v33, %v1626_v41 }
 0x730   :  { %v1664_v37 = vpop.f32.mrb[62].mxu0  ;;  %v1706_v38 = vpop.f32.mrb[62].mxu1 }
 0x731   :  { %v2433_v39 = vpop.f32.mrb[63].mxu0  ;;  %v2441_v40 = vpop.f32.mrb[63].mxu1  ;;  %v2075_v42 = vmul.f32 -1.442695, %v1709_v8 }
 0x733   :  { %2603 = vpow2.f32 %v2075_v42 }
 0x734   :  { %2605 = vtanh.f32 %v1667_v43 }
 0x735   :  { %v2600_v44 = vpop.eup %2599 }
 0x736   :  { %v2602_v45 = vpop.eup %2601  ;;  %v1713_v9 = vadd.f32 1.0, %v2600_v44 }
 0x737   :  { %v1719_v10 = vadd.f32 1.0, %v2602_v45 }
 0x738   :  { %2607 = vrcp.f32 %v1713_v9  ;;  %v2083_v9 = vld [vmem:[%s3074_s5] ss:$0 sm:$0xff] }
 0x739   :  { %2609 = vrcp.f32 %v1719_v10 }
 0x73d   :  { %v2604_v46 = vpop.eup %2603 }
 0x73e   :  { %v2606_v47 = vpop.eup %2605  ;;  %v1726_v51 = vadd.f32 1.0, %v2604_v46 }
 0x740   :  { %2611 = vrcp.f32 %v1726_v51 }
 0x742   :  { %v2608_v48 = vpop.eup %2607 }
 0x743   :  { %v2610_v49 = vpop.eup %2609  ;;  %v1730_v50 = vmul.f32 %v2608_v48, %v2606_v47 }
 0x744   :  { %v1729_v52 = vmul.f32 %v2610_v49, %v3007_v6 }
 0x746   :  { %v3036_v53 = vadd.f32 %v1730_v50, %v1729_v52 }
 0x748   :  { %2613 = vtanh.f32 %v3036_v53 }
 0x74a   :  { %v2612_v54 = vpop.eup %2611 }
 0x752   :  { %v2614_v55 = vpop.eup %2613 }
 0x753   :  { %v1733_v56 = vmul.f32 %v2614_v55, %v2612_v54 }
 0x755   :  { %1734 = vst.msk [vmem:[#allocation6 + $0x6] sm:$0x1] %vm551_vm3, %v1733_v56  ;;  %v1735_v57 = vpack.c.bf16 %v1733_v56, %v1733_v56 }
 0x757   :  { %2447 = vmatmul.mubr.msk.bf16.vlgmr.msra.gmra.mrb[64].mxu0 %vm113_vm2, %v1735_v57  ;;  %2455 = vmatmul.mubr.msk.bf16.vlgmr.msra.gmra.mrb[64].mxu1 %vm113_vm2, %v1735_v57 }
 0x758   :  { %2459 = vmatpush3.bf16.msra.mxu0 %v2635_v58  ;;  %2467 = vmatpush3.bf16.msra.mxu1 %v2636_v59 }
 0x759   :  { %2460 = vmatprep.subr.bf16.mxu0 %v2691_v0  ;;  %2468 = vmatprep.subr.bf16.mxu1 %v2691_v0 }
 0x75a   :  { %2462 = vmatprep.mubr.msk.bf16.mxu0 %vm2692_vm0, %v2691_v0  ;;  %2470 = vmatprep.mubr.msk.bf16.mxu1 %vm2692_vm0, %v2691_v0 }
 0x75c   :  { %2461 = vmatpush3.bf16.msra.mxu0 %v2637_v60  ;;  %2469 = vmatpush3.bf16.msra.mxu1 %v2638_v61 }
 0x75d   :  { %2474 = vmatprep.subr.bf16.mxu0 %v2691_v0 }
 0x75f   :  { %2463 = vmatmul.mubr.msk.bf16.vlgmr.msra.gmra.mrb[68].mxu0 %vm113_vm2, %v1735_v57  ;;  %2471 = vmatmul.mubr.msk.bf16.vlgmr.msra.gmra.mrb[68].mxu1 %vm113_vm2, %v1735_v57 }
 0x760   :  { %2478 = vmatprep.mubr.msk.bf16.mxu0 %vm2692_vm0, %v2691_v0  ;;  %2475 = vmatpush3.bf16.msra.mxu0 %v2501_v62 }
 0x761   :  { %2476 = vmatprep.subr.bf16.mxu0 %v2691_v0 }
 0x764   :  { %2477 = vmatpush3.bf16.msra.mxu0 %v2502_v63 }
 0x82a   :  { %v1774_v2 = vpop.f32.mrb[64].mxu0  ;;  %v1816_v4 = vpop.f32.mrb[64].mxu1 }
 0x82b   :  { %v1780_v5 = vadd.f32 %v1774_v2, %v1736_v1  ;;  %v1822_v6 = vadd.f32 %v1816_v4, %v1781_v3  ;;  %v2448_v13 = vpop.f32.mrb[65].mxu0  ;;  %v2456_v16 = vpop.f32.mrb[65].mxu1 }
 0x82c   :  { %v1777_v17 = vpop.f32.mrb[66].mxu0  ;;  %v1819_v18 = vpop.f32.mrb[66].mxu1 }
 0x82d   :  { %v2080_v11 = vmul.f32 -1.442695, %v1780_v5  ;;  %v2081_v12 = vmul.f32 -1.442695, %v1822_v6  ;;  %v2449_v14 = vpop.f32.mrb[67].mxu0  ;;  %v2457_v15 = vpop.f32.mrb[67].mxu1 }
 0x82f   :  { %2615 = vpow2.f32 %v2080_v11 }
 0x830   :  { %2617 = vpow2.f32 %v2081_v12 }
 0x832   :  { %v1858_v19 = vpop.f32.mrb[68].mxu0  ;;  %v1900_v0 = vpop.f32.mrb[68].mxu1 }
 0x833   :  { %v1906_v21 = vadd.f32 %v1900_v0, %v1865_v20  ;;  %v2464_v22 = vpop.f32.mrb[69].mxu0  ;;  %v2472_v23 = vpop.f32.mrb[69].mxu1  ;;  %v1864_v30 = vadd.f32 %v1858_v19, %v1823_v28 }
 0x834   :  { %v1861_v24 = vpop.f32.mrb[70].mxu0  ;;  %v1903_v25 = vpop.f32.mrb[70].mxu1 }
 0x835   :  { %v2465_v26 = vpop.f32.mrb[71].mxu0  ;;  %v2473_v27 = vpop.f32.mrb[71].mxu1  ;;  %v2082_v29 = vmul.f32 -1.442695, %v1906_v21 }
 0x837   :  { %2619 = vpow2.f32 %v2082_v29 }
 0x838   :  { %2621 = vtanh.f32 %v1864_v30 }
 0x839   :  { %v2616_v31 = vpop.eup %2615 }
 0x83a   :  { %v2618_v32 = vpop.eup %2617  ;;  %v1910_v33 = vadd.f32 1.0, %v2616_v31 }
 0x83b   :  { %v1916_v34 = vadd.f32 1.0, %v2618_v32 }
 0x83c   :  { %2623 = vrcp.f32 %v1910_v33 }
 0x83d   :  { %2625 = vrcp.f32 %v1916_v34 }
 0x841   :  { %v2620_v7 = vpop.eup %2619 }
 0x842   :  { %v2622_v8 = vpop.eup %2621  ;;  %v1923_v38 = vadd.f32 1.0, %v2620_v7 }
 0x844   :  { %2627 = vrcp.f32 %v1923_v38 }
 0x846   :  { %v2624_v35 = vpop.eup %2623 }
 0x847   :  { %v2626_v36 = vpop.eup %2625  ;;  %v1927_v37 = vmul.f32 %v2624_v35, %v2622_v8 }
 0x848   :  { %v1926_v39 = vmul.f32 %v2626_v36, %v3036_v53 }
 0x84a   :  { %v1928_v40 = vadd.f32 %v1927_v37, %v1926_v39 }
 0x84c   :  { %2629 = vtanh.f32 %v1928_v40 }
 0x84e   :  { %v2628_v41 = vpop.eup %2627 }
 0x856   :  { %v2630_v42 = vpop.eup %2629 }
 0x857   :  { %v1930_v43 = vmul.f32 %v2630_v42, %v2628_v41 }
 0x859   :  { %1931 = vst.msk [vmem:[#allocation6 + $0x7] sm:$0x1] %vm551_vm3, %v1930_v43 }
 0x860   :  { %v1932_v44 = vld [vmem:[#allocation6] sm:$0xff] }
 0x861   :  { %v1933_v45 = vpack.c.bf16 %v1932_v44, %v1932_v44 }
 0x863   :  { %2479 = vmatmul.mubr.msk.bf16.vlgmr.msra.gmra.mrb[72].mxu0 %vm113_vm2, %v1933_v45 }
 0x936   :  { %v1994_v10 = vpop.f32.mrb[72].mxu0 }
 0x937   :  { %v1995_v46 = vadd.f32 %v2083_v9, %v1994_v10  ;;  %v2480_v47 = vpop.f32.mrb[73].mxu0 }
 0x938   :  { %v1997_v48 = vpop.f32.mrb[74].mxu0 }
 0x939   :  { %2001 = vst.msk [vmem:[%s3075_s6] sm:$0xff] %vm2000_vm4, %v1995_v46  ;;  %v2481_v49 = vpop.f32.mrb[75].mxu0 }
 0x93a   :  { %2006 = vsyncpa [#allocation8], 1 }
 0x93b   :  { %2007 = vsyncpa [#allocation10], 1 }

</bundles_post_ra>
